<compile_context>
chip_gen: v6e
topology: v6e:2x2x1
jax: 0.10.0
libtpu: 0.0.40
codegen_flags: <defaults>
</compile_context>

<pallas_src>
import functools
import math

import jax
import jax.numpy as jnp
from jax.experimental import pallas as pl
from jax.experimental.pallas import tpu as pltpu


def _sage_layer_kernel(blk_ref, fetch_ref,            # scalar prefetch (SMEM)
                       a_ref, hc_ref, hs_ref, inv_ref, ws_ref, wn_ref, b_ref,
                       o_ref, acc_ref, *, relu):
    """One SAGEConv('mean') layer.

    Grid = (row_block i  [parallel], col_block k  [arbitrary / reduction]).
      a_ref   : [TM, TK]  int8  binary adjacency tile (i, k)  (skipped if empty)
      hc_ref  : [TK, Din] bf16  input-feature column block k
      hs_ref  : [TM, Din] bf16  input-feature row block i (self features)
      inv_ref : [TM, 1]   f32   1 / in-degree of row block i
      ws_ref  : [Din, Dout] bf16, wn_ref : [Din, Dout] bf16, b_ref : [1, Dout] f32
      o_ref   : [TM, Dout]      output tile (written at k == last)
      acc_ref : [TM, Din] f32   neighbor-sum accumulator (VMEM scratch)
    """
    i = pl.program_id(0)
    k = pl.program_id(1)
    nbk = pl.num_programs(1)

    @pl.when(k == 0)
    def _init():
        acc_ref[...] = jnp.zeros_like(acc_ref)

    # Raw neighbor-feature sum on the MXU; all-zero adjacency tiles do no work
    # (and their DMA was already elided by the fetch-index index_map).
    @pl.when(blk_ref[i * nbk + k] > 0)
    def _aggregate():
        a = a_ref[...].astype(jnp.bfloat16)           # binary {0, 1}
        acc_ref[...] += jnp.dot(a, hc_ref[...],
                                preferred_element_type=jnp.float32)

    @pl.when(k == nbk - 1)
    def _finalize():
        # Mean = sum * (1/deg), applied once in f32 (exact per-row scale).
        h_neigh = (acc_ref[...] * inv_ref[...]).astype(jnp.bfloat16)
        # Two accumulating MXU dots instead of a lane-axis concat.
        out = jnp.dot(hs_ref[...], ws_ref[...],
                      preferred_element_type=jnp.float32)
        out = out + jnp.dot(h_neigh, wn_ref[...],
                            preferred_element_type=jnp.float32)
        out = out + b_ref[...]
        if relu:                                       # static per-layer branch
            out = jnp.maximum(out, 0.0)
        # TODO(synk): dropout(p=0.5) between layers is identity (eval semantics).
        o_ref[...] = out.astype(o_ref.dtype)


def _round_up(x, m):
    return ((x + m - 1) // m) * m


def _sage_layer(blk, fetch, a_i8, inv_deg, h, w_self, w_neigh, b,
                *, tm, tk, relu, out_dtype):
    """Run one SAGEConv layer as a pallas_call on padded operands."""
    n_pad, din = h.shape
    dout = w_self.shape[1]
    nbm = n_pad // tm
    nbk = n_pad // tk
    out_bytes = 4 if out_dtype == jnp.float32 else 2

    in_specs = [
        # Adjacency tile (i, k): for empty blocks the fetch table returns the
        # previously-fetched nonzero block index -> Pallas skips the DMA.
        pl.BlockSpec((tm, tk),
                     lambda i, k, blk_s, fetch_s: (i, fetch_s[i * nbk + k])),
        # Feature column block (paired with the same fetch-skip).
        pl.BlockSpec((tk, din),
                     lambda i, k, blk_s, fetch_s: (fetch_s[i * nbk + k], 0)),
        # Self features: row block i, fetched once per row block.
        pl.BlockSpec((tm, din), lambda i, k, blk_s, fetch_s: (i, 0)),
        # Per-row 1/in-degree.
        pl.BlockSpec((tm, 1), lambda i, k, blk_s, fetch_s: (i, 0)),
        # Weights / bias: resident for the whole call.
        pl.BlockSpec((din, dout), lambda i, k, blk_s, fetch_s: (0, 0)),
        pl.BlockSpec((din, dout), lambda i, k, blk_s, fetch_s: (0, 0)),
        pl.BlockSpec((1, dout), lambda i, k, blk_s, fetch_s: (0, 0)),
    ]
    out_specs = pl.BlockSpec((tm, dout), lambda i, k, blk_s, fetch_s: (i, 0))

    # VMEM: double-buffered streaming tiles + persistent accumulator + headroom.
    vmem_bytes = (2 * tm * tk * 1            # int8 adjacency tile
                  + 2 * tk * din * 2         # feature column tile (bf16)
                  + 2 * tm * din * 2         # self feature tile (bf16)
                  + 2 * tm * 4               # inv-degree tile
                  + 2 * 2 * din * dout * 2   # W_self + W_neigh
                  + 2 * dout * 4             # bias
                  + 2 * tm * dout * out_bytes
                  + tm * din * 4             # accumulator scratch
                  + (8 << 20))               # headroom

    flops = 2 * n_pad * n_pad * din + 2 * 2 * n_pad * din * dout
    bytes_accessed = (n_pad * n_pad                       # int8 adjacency
                      + 2 * n_pad * din * 2               # feature streams
                      + 2 * din * dout * 2 + dout * 4     # weights / bias
                      + n_pad * dout * out_bytes)         # output

    return pl.pallas_call(
        functools.partial(_sage_layer_kernel, relu=relu),
        out_shape=jax.ShapeDtypeStruct((n_pad, dout), out_dtype),
        grid_spec=pltpu.PrefetchScalarGridSpec(
            num_scalar_prefetch=2,
            grid=(nbm, nbk),
            in_specs=in_specs,
            out_specs=out_specs,
            scratch_shapes=[pltpu.VMEM((tm, din), jnp.float32)],
        ),
        compiler_params=pltpu.CompilerParams(
            dimension_semantics=("parallel", "arbitrary"),
            vmem_limit_bytes=int(vmem_bytes),
        ),
        cost_estimate=pl.CostEstimate(flops=int(flops), transcendentals=0,
                                      bytes_accessed=int(bytes_accessed)),
    )(blk, fetch, a_i8, h, h, inv_deg, w_self, w_neigh, b)


def sage_forward(adj, x, params, *, tm=256, tk=512):
    """Multi-layer GraphSAGE ('mean') forward.

    adj    : [N, N]; adj[i, j] != 0 means edge j -> i (j is an in-neighbor of i).
    x      : [N, D_in] f32 node features.
    params : list of (W_self [Din, Dout], W_neigh [Din, Dout], b [Dout]).
    """
    n = x.shape[0]
    num_layers = len(params)

    n_pad = _round_up(max(n, 1), math.lcm(tm, tk))
    nbm = n_pad // tm
    nbk = n_pad // tk

    # ---- binary int8 adjacency + exact f32 per-row inverse degree -----------
    adj_bin = (adj != 0)
    a_i8 = jnp.zeros((n_pad, n_pad), jnp.int8).at[:n, :n].set(
        adj_bin.astype(jnp.int8))
    deg = jnp.sum(adj_bin, axis=1).astype(jnp.float32)
    inv = jnp.where(deg > 0, 1.0 / jnp.maximum(deg, 1.0), 0.0)
    inv_deg = jnp.zeros((n_pad, 1), jnp.float32).at[:n, 0].set(inv)

    # ---- block occupancy + DMA-skip fetch table (from the int8 source) ------
    blk2d = a_i8.reshape(nbm, tm, nbk, tk).max(axis=(1, 3)) > 0
    col = jnp.broadcast_to(jnp.arange(nbk, dtype=jnp.int32)[None, :], (nbm, nbk))
    # carry-forward of the last nonzero column-block index (0 before the first)
    fetch2d = jnp.maximum(
        jax.lax.cummax(jnp.where(blk2d, col, jnp.int32(-1)), axis=1), 0)
    blk = blk2d.astype(jnp.int32).reshape(-1)         # flat 1D -> cheap SMEM
    fetch = fetch2d.astype(jnp.int32).reshape(-1)

    # ---- pad features (zero padding keeps the math exact) -------------------
    din_pad = _round_up(x.shape[1], 128)
    h = jnp.zeros((n_pad, din_pad), jnp.bfloat16).at[:n, :x.shape[1]].set(
        x.astype(jnp.bfloat16))

    for l, (ws, wn, b) in enumerate(params):
        di, do = ws.shape
        di_pad = h.shape[1]
        do_pad = _round_up(do, 128)
        ws_p = jnp.zeros((di_pad, do_pad), jnp.bfloat16).at[:di, :do].set(
            ws.astype(jnp.bfloat16))
        wn_p = jnp.zeros((di_pad, do_pad), jnp.bfloat16).at[:di, :do].set(
            wn.astype(jnp.bfloat16))
        b_p = jnp.zeros((1, do_pad), jnp.float32).at[0, :do].set(
            b.reshape(-1).astype(jnp.float32))

        last = (l == num_layers - 1)
        h = _sage_layer(blk, fetch, a_i8, inv_deg, h, ws_p, wn_p, b_p,
                        tm=tm, tk=tk, relu=not last,
                        out_dtype=jnp.float32 if last else jnp.bfloat16)

    out_size = params[-1][0].shape[1]
    return h[:n, :out_size]


def init_params(key, in_size, hid_size, out_size):
    """Deterministic (glorot-ish) init of the 3 SAGEConv layers."""
    sizes = [(in_size, hid_size), (hid_size, hid_size), (hid_size, out_size)]
    params = []
    for d_in, d_out in sizes:
        key, k1, k2 = jax.random.split(key, 3)
        scale = jnp.sqrt(2.0 / (d_in + d_out)).astype(jnp.float32)
        w_self = jax.random.normal(k1, (d_in, d_out), jnp.float32) * scale
        w_neigh = jax.random.normal(k2, (d_in, d_out), jnp.float32) * scale
        b = jnp.zeros((d_out,), jnp.float32)
        params.append((w_self, w_neigh, b))
    return params


def sage_reference(a_norm, x, params):
    """Pure-JAX f32 reference of the same forward pass."""
    h = x
    for l, (ws, wn, b) in enumerate(params):
        h_neigh = a_norm @ h
        h = h @ ws + h_neigh @ wn + b
        if l != len(params) - 1:
            h = jnp.maximum(h, 0.0)
    return h


if __name__ == "__main__":
    # Small synthetic graph: N nodes, ~15%-dense adjacency, mean aggregation.
    N = 200
    in_size, hid_size, out_size = 60, 32, 16

    key = jax.random.PRNGKey(0)
    k_adj, k_feat, k_par = jax.random.split(key, 3)

    # adj[i, j] = 1 means edge j -> i (j is an in-neighbor of i).
    adj = (jax.random.uniform(k_adj, (N, N)) < 0.15).astype(jnp.float32)
    deg = jnp.sum(adj, axis=1, keepdims=True)
    a_norm = adj / jnp.maximum(deg, 1.0)   # zero-in-degree rows stay all-zero

    x = jax.random.normal(k_feat, (N, in_size), jnp.float32)
    params = init_params(k_par, in_size, hid_size, out_size)

    out = jax.block_until_ready(sage_forward(adj, x, params))
    ref = sage_reference(a_norm, x, params)

    assert out.shape == (N, out_size), out.shape
    assert bool(jnp.all(jnp.isfinite(out)))
    err = float(jnp.max(jnp.abs(out - ref)))
    tol = 0.03 + 0.03 * float(jnp.max(jnp.abs(ref)))   # bf16 features/weights
    assert err < tol, f"max |err| vs f32 reference = {err} (tol {tol})"
    print("KERNEL_OK")
</pallas_src>

<mosaic_0001>
module attributes {stable_mosaic.version = 11 : i64} {
  func.func @_sage_layer_kernel(%arg0: i32, %arg1: i32, %arg2: memref<2xi32, #tpu.memory_space<smem>>, %arg3: memref<2xi32, #tpu.memory_space<smem>>, %arg4: memref<256x512xi8, #tpu.memory_space<vmem>>, %arg5: memref<512x128xbf16, #tpu.memory_space<vmem>>, %arg6: memref<256x128xbf16, #tpu.memory_space<vmem>>, %arg7: memref<256x1xf32, #tpu.memory_space<vmem>>, %arg8: memref<128x128xbf16, #tpu.memory_space<vmem>>, %arg9: memref<128x128xbf16, #tpu.memory_space<vmem>>, %arg10: memref<1x128xf32, #tpu.memory_space<vmem>>, %arg11: memref<256x128xbf16, #tpu.memory_space<vmem>>, %arg12: memref<256x128xf32, #tpu.memory_space<vmem>>) attributes {dimension_semantics = [#tpu.dimension_semantics<parallel>, #tpu.dimension_semantics<arbitrary>], iteration_bounds = array<i64: 2, 1>, scalar_prefetch = 2 : i64, scratch_operands = 1 : i64, tpu.core_type = #tpu.core_type<tc>, window_params = [{transform_indices = @transform_0, window_bounds = array<i64: 256, 512>}, {transform_indices = @transform_1, window_bounds = array<i64: 512, 128>}, {transform_indices = @transform_2, window_bounds = array<i64: 256, 128>}, {transform_indices = @transform_3, window_bounds = array<i64: 256, 1>}, {pipeline_mode = #tpu.pipeline_mode<synchronous>, transform_indices = @transform_4, window_bounds = array<i64: 128, 128>}, {pipeline_mode = #tpu.pipeline_mode<synchronous>, transform_indices = @transform_5, window_bounds = array<i64: 128, 128>}, {pipeline_mode = #tpu.pipeline_mode<synchronous>, transform_indices = @transform_6, window_bounds = array<i64: 1, 128>}, {transform_indices = @transform_7, window_bounds = array<i64: 256, 128>}]} {
    %c0_i32 = arith.constant 0 : i32
    %0 = arith.cmpi eq, %arg1, %c0_i32 : i32
    %1 = arith.extui %0 : i1 to i32
    %c0_i32_0 = arith.constant 0 : i32
    %2 = arith.cmpi ne, %1, %c0_i32_0 : i32
    scf.if %2 {
      %cst = arith.constant 0.000000e+00 : f32
      %13 = vector.broadcast %cst : f32 to vector<256x128xf32>
      %c0 = arith.constant 0 : index
      %c0_5 = arith.constant 0 : index
      %14 = vector.load %arg12[%c0, %c0_5] : memref<256x128xf32, #tpu.memory_space<vmem>>, vector<256x128xf32>
      tpu.vector_store %arg12[%c0, %c0_5], %13 {strides = array<i32>} : memref<256x128xf32, #tpu.memory_space<vmem>>, vector<256x128xf32>,
    } else {
    }
    %c1_i32 = arith.constant 1 : i32
    %3 = arith.muli %arg0, %c1_i32 : i32
    %4 = arith.addi %3, %arg1 : i32
    %5 = arith.index_cast %4 : i32 to index
    %6 = memref.load %arg2[%5] : memref<2xi32, #tpu.memory_space<smem>>
    %c0_i32_1 = arith.constant 0 : i32
    %7 = arith.cmpi sgt, %6, %c0_i32_1 : i32
    %8 = arith.extui %7 : i1 to i32
    %c0_i32_2 = arith.constant 0 : i32
    %9 = arith.cmpi ne, %8, %c0_i32_2 : i32
    scf.if %9 {
      %c0 = arith.constant 0 : index
      %c0_5 = arith.constant 0 : index
      %13 = vector.load %arg4[%c0, %c0_5] : memref<256x512xi8, #tpu.memory_space<vmem>>, vector<256x512xi8>
      %14 = arith.sitofp %13 : vector<256x512xi8> to vector<256x512xbf16>
      %c0_6 = arith.constant 0 : index
      %c0_7 = arith.constant 0 : index
      %15 = vector.load %arg12[%c0_6, %c0_7] : memref<256x128xf32, #tpu.memory_space<vmem>>, vector<256x128xf32>
      %c0_8 = arith.constant 0 : index
      %c0_9 = arith.constant 0 : index
      %16 = vector.load %arg5[%c0_8, %c0_9] : memref<512x128xbf16, #tpu.memory_space<vmem>>, vector<512x128xbf16>
      %cst = arith.constant dense<0.000000e+00> : vector<256x128xf32>
      %17 = tpu.matmul %14, %16, %cst {dimension_numbers = #tpu.dot_dimension_numbers<[1], [0], [0], [1], [0, 0, 1, 1], [], []>} : vector<256x512xbf16>, vector<512x128xbf16>, vector<256x128xf32> -> vector<256x128xf32>
      %18 = arith.addf %15, %17 : vector<256x128xf32>
      %c0_10 = arith.constant 0 : index
      %c0_11 = arith.constant 0 : index
      %19 = vector.load %arg12[%c0_10, %c0_11] : memref<256x128xf32, #tpu.memory_space<vmem>>, vector<256x128xf32>
      tpu.vector_store %arg12[%c0_10, %c0_11], %18 {strides = array<i32>} : memref<256x128xf32, #tpu.memory_space<vmem>>, vector<256x128xf32>,
    } else {
    }
    %c0_i32_3 = arith.constant 0 : i32
    %10 = arith.cmpi eq, %arg1, %c0_i32_3 : i32
    %11 = arith.extui %10 : i1 to i32
    %c0_i32_4 = arith.constant 0 : i32
    %12 = arith.cmpi ne, %11, %c0_i32_4 : i32
    scf.if %12 {
      %c0 = arith.constant 0 : index
      %c0_5 = arith.constant 0 : index
      %13 = vector.load %arg12[%c0, %c0_5] : memref<256x128xf32, #tpu.memory_space<vmem>>, vector<256x128xf32>
      %c0_6 = arith.constant 0 : index
      %c0_7 = arith.constant 0 : index
      %14 = vector.load %arg7[%c0_6, %c0_7] : memref<256x1xf32, #tpu.memory_space<vmem>>, vector<256x1xf32>
      %15 = vector.broadcast %14 : vector<256x1xf32> to vector<256x128xf32>
      %16 = arith.mulf %13, %15 : vector<256x128xf32>
      %17 = arith.truncf %16 : vector<256x128xf32> to vector<256x128xbf16>
      %c0_8 = arith.constant 0 : index
      %c0_9 = arith.constant 0 : index
      %18 = vector.load %arg6[%c0_8, %c0_9] : memref<256x128xbf16, #tpu.memory_space<vmem>>, vector<256x128xbf16>
      %c0_10 = arith.constant 0 : index
      %c0_11 = arith.constant 0 : index
      %19 = vector.load %arg8[%c0_10, %c0_11] : memref<128x128xbf16, #tpu.memory_space<vmem>>, vector<128x128xbf16>
      %cst = arith.constant dense<0.000000e+00> : vector<256x128xf32>
      %20 = tpu.matmul %18, %19, %cst {dimension_numbers = #tpu.dot_dimension_numbers<[1], [0], [0], [1], [0, 0, 1, 1], [], []>} : vector<256x128xbf16>, vector<128x128xbf16>, vector<256x128xf32> -> vector<256x128xf32>
      %c0_12 = arith.constant 0 : index
      %c0_13 = arith.constant 0 : index
      %21 = vector.load %arg9[%c0_12, %c0_13] : memref<128x128xbf16, #tpu.memory_space<vmem>>, vector<128x128xbf16>
      %cst_14 = arith.constant dense<0.000000e+00> : vector<256x128xf32>
      %22 = tpu.matmul %17, %21, %cst_14 {dimension_numbers = #tpu.dot_dimension_numbers<[1], [0], [0], [1], [0, 0, 1, 1], [], []>} : vector<256x128xbf16>, vector<128x128xbf16>, vector<256x128xf32> -> vector<256x128xf32>
      %23 = arith.addf %20, %22 : vector<256x128xf32>
      %c0_15 = arith.constant 0 : index
      %c0_16 = arith.constant 0 : index
      %24 = vector.load %arg10[%c0_15, %c0_16] : memref<1x128xf32, #tpu.memory_space<vmem>>, vector<1x128xf32>
      %25 = vector.broadcast %24 : vector<1x128xf32> to vector<256x128xf32>
      %26 = arith.addf %23, %25 : vector<256x128xf32>
      %cst_17 = arith.constant 0.000000e+00 : f32
      %27 = vector.broadcast %cst_17 : f32 to vector<256x128xf32>
      %28 = arith.maximumf %26, %27 : vector<256x128xf32>
      %29 = arith.truncf %28 : vector<256x128xf32> to vector<256x128xbf16>
      %c0_18 = arith.constant 0 : index
      %c0_19 = arith.constant 0 : index
      %30 = vector.load %arg11[%c0_18, %c0_19] : memref<256x128xbf16, #tpu.memory_space<vmem>>, vector<256x128xbf16>
      tpu.vector_store %arg11[%c0_18, %c0_19], %29 {strides = array<i32>} : memref<256x128xbf16, #tpu.memory_space<vmem>>, vector<256x128xbf16>,
    } else {
    }
    return
  }
  func.func @transform_0(%arg0: i32, %arg1: i32, %arg2: memref<2xi32, #tpu.memory_space<smem>>, %arg3: memref<2xi32, #tpu.memory_space<smem>>) -> (i32, i32) {
    %c1_i32 = arith.constant 1 : i32
    %0 = arith.muli %arg0, %c1_i32 : i32
    %1 = arith.addi %0, %arg1 : i32
    %2 = arith.index_cast %1 : i32 to index
    %3 = memref.load %arg3[%2] : memref<2xi32, #tpu.memory_space<smem>>
    %c0_i32 = arith.constant 0 : i32
    return %arg0, %3 : i32, i32
  }
  func.func @transform_1(%arg0: i32, %arg1: i32, %arg2: memref<2xi32, #tpu.memory_space<smem>>, %arg3: memref<2xi32, #tpu.memory_space<smem>>) -> (i32, i32) {
    %c1_i32 = arith.constant 1 : i32
    %0 = arith.muli %arg0, %c1_i32 : i32
    %1 = arith.addi %0, %arg1 : i32
    %2 = arith.index_cast %1 : i32 to index
    %3 = memref.load %arg3[%2] : memref<2xi32, #tpu.memory_space<smem>>
    %c0_i32 = arith.constant 0 : i32
    %c0_i32_0 = arith.constant 0 : i32
    return %3, %c0_i32 : i32, i32
  }
  func.func @transform_2(%arg0: i32, %arg1: i32, %arg2: memref<2xi32, #tpu.memory_space<smem>>, %arg3: memref<2xi32, #tpu.memory_space<smem>>) -> (i32, i32) {
    %c0_i32 = arith.constant 0 : i32
    %c0_i32_0 = arith.constant 0 : i32
    return %arg0, %c0_i32 : i32, i32
  }
  func.func @transform_3(%arg0: i32, %arg1: i32, %arg2: memref<2xi32, #tpu.memory_space<smem>>, %arg3: memref<2xi32, #tpu.memory_space<smem>>) -> (i32, i32) {
    %c0_i32 = arith.constant 0 : i32
    %c0_i32_0 = arith.constant 0 : i32
    return %arg0, %c0_i32 : i32, i32
  }
  func.func @transform_4(%arg0: i32, %arg1: i32, %arg2: memref<2xi32, #tpu.memory_space<smem>>, %arg3: memref<2xi32, #tpu.memory_space<smem>>) -> (i32, i32) {
    %c0_i32 = arith.constant 0 : i32
    %c0_i32_0 = arith.constant 0 : i32
    %c0_i32_1 = arith.constant 0 : i32
    return %c0_i32, %c0_i32_0 : i32, i32
  }
  func.func @transform_5(%arg0: i32, %arg1: i32, %arg2: memref<2xi32, #tpu.memory_space<smem>>, %arg3: memref<2xi32, #tpu.memory_space<smem>>) -> (i32, i32) {
    %c0_i32 = arith.constant 0 : i32
    %c0_i32_0 = arith.constant 0 : i32
    %c0_i32_1 = arith.constant 0 : i32
    return %c0_i32, %c0_i32_0 : i32, i32
  }
  func.func @transform_6(%arg0: i32, %arg1: i32, %arg2: memref<2xi32, #tpu.memory_space<smem>>, %arg3: memref<2xi32, #tpu.memory_space<smem>>) -> (i32, i32) {
    %c0_i32 = arith.constant 0 : i32
    %c0_i32_0 = arith.constant 0 : i32
    %c0_i32_1 = arith.constant 0 : i32
    return %c0_i32, %c0_i32_0 : i32, i32
  }
  func.func @transform_7(%arg0: i32, %arg1: i32, %arg2: memref<2xi32, #tpu.memory_space<smem>>, %arg3: memref<2xi32, #tpu.memory_space<smem>>) -> (i32, i32) {
    %c0_i32 = arith.constant 0 : i32
    %c0_i32_0 = arith.constant 0 : i32
    return %arg0, %c0_i32 : i32, i32
  }
}

</mosaic_0001>

<bundles_post_ra>
// kernel: tpu_custom_call.1
= control target key start
LH: loop header
LB: loop body
LE: loop exit
PB: predicated region body
PF: predicated region fallthrough
CT: control target
= control target key end

     0   :  { %s4214_s0 = inlined_call_operand.vmem [shape: s32[2], index: 0, kind: input, shape index: {}]   ;;  %s4215_s2 = inlined_call_operand.vmem [shape: s8[512,512], index: 2, kind: input, shape index: {}]   ;;  %s4216_s3 = inlined_call_operand.hbm [shape: bf16[512,128], index: 3, kind: input, shape index: {}]   ;;  %s4217_s4 = inlined_call_operand.hbm [shape: bf16[512,128], index: 4, kind: input, shape index: {}]   ;;  %s4218_s5 = inlined_call_operand.vmem [shape: f32[512,1], index: 5, kind: input, shape index: {}]   ;;  %s4219_s6 = inlined_call_operand.hbm [shape: bf16[128,128], index: 6, kind: input, shape index: {}]   ;;  %s4220_s7 = inlined_call_operand.hbm [shape: bf16[128,128], index: 7, kind: input, shape index: {}]   ;;  %s4221_s8 = inlined_call_operand.vmem [shape: f32[1,128], index: 8, kind: input, shape index: {}]   ;;  %s4222_s9 = inlined_call_operand.hbm [shape: bf16[512,128], index: 9, kind: output, shape index: {}]   ;;  %s4223_s1 = inlined_call_operand.vmem [shape: s32[2], index: 1, kind: input, shape index: {}]  }
   0x1   :  { %4239 = sst [smem:[#allocation28_spill]] %s4215_s2  ;;  %s14_s11 = sshll.u32 %s4214_s0, 4  ;;  %s15_s11 = int_to_ptr.vmem [resolvable:$true] %s14_s11 }
   0x2   :  { %4240 = sst [smem:[#allocation29_spill]] %s4216_s3  ;;  %s18_s14 = sshll.u32 %s4223_s1, 4  ;;  %s19_s14 = int_to_ptr.vmem [resolvable:$true] %s18_s14 }
   0x3   :  { %4241 = sst [smem:[#allocation30_spill]] %s4219_s6  ;;  %s3357_s15 = scalar_lea.vmem %s15_s11, 16 }
   0x4   :  { %4242 = sst [smem:[#allocation31_spill]] %s4220_s7  ;;  %p3358_p0 = scmp.ne.s32.totalorder %s15_s11, %s3357_s15 }
   0x5   :  { %4243 = sst [smem:[#allocation32_spill]] %s4221_s8  ;;  %p3362_p1 = scmp.lt.s32.totalorder %s15_s11, %s15_s11 }
   0x6   :  { %4244 = sst [smem:[#allocation33_spill]] %s4222_s9  ;;  %p3363_p2 = scmp.lt.s32.totalorder %s3357_s15, %s3357_s15 }
   0x8   :  { %p3364_p3 = por %p3363_p2, %p3362_p1 }
   0xa   :  { %p3365_p4 = pnand %p3364_p3, %p3358_p0 }
   0xc   :  { %3368 = shalt.err (!%p3365_p4)  }
   0xd   :  { %s3609_s16 = smov [#allocation4]   ;;  %s3369_s17 = scalar_lea.vmem %s19_s14, 16 }
   0xe   :  { %17 = dma.vmem_to_smem %s15_s11, 16, %s3609_s16, [#allocation3] }
   0xf   :  { %p3370_p5 = scmp.ne.s32.totalorder %s19_s14, %s3369_s17  ;;  %p3374_p6 = scmp.lt.s32.totalorder %s19_s14, %s19_s14 }
  0x10   :  { %p3375_p7 = scmp.lt.s32.totalorder %s3369_s17, %s3369_s17 }
  0x12   :  { %p3376_p8 = por %p3375_p7, %p3374_p6 }
  0x14   :  { %p3377_p9 = pnand %p3376_p8, %p3370_p5 }
  0x16   :  { %3380 = shalt.err (!%p3377_p9)  }
  0x17   :  { %s3610_s0 = smov [#allocation5]  }
  0x18   :  { %21 = dma.vmem_to_smem %s19_s14, 16, %s3610_s0, [#allocation3] }
  0x19   :  { %3551 = dma.done.wait [#allocation3], 32 }
  0x1a   :  { %3552 = vsyncadd [#allocation3], 4294967264 }
  0x1b   :  { %23 = sfence }
  0x1c   :  { %24 = vsyncpa [#allocation7], 0 }
  0x1d   :  { %26 = vsyncpa [#allocation7 + $0x1], 0 }
  0x1e   :  { %27 = vsyncpa [#allocation10], 0 }
  0x1f   :  { %29 = vsyncpa [#allocation10 + $0x1], 0 }
  0x20   :  { %30 = vsyncpa [#allocation13], 0 }
  0x21   :  { %31 = vsyncpa [#allocation8], 0 }
  0x22   :  { %33 = vsyncpa [#allocation8 + $0x1], 0  ;;  %s3678_s1 = smov 0   ;;  %s3680_s18 = smov 0  }
  0x23   :  { %s3682_s19 = smov 0   ;;  %s3684_s20 = smov 0  }
  0x24   :  { %s3686_s21 = smov 0   ;;  %s3688_s22 = smov 0  }
  0x25   :  { %s3690_s23 = smov 0   ;;  %s3692_s24 = smov 0  }
  0x26   :  { %s3694_s25 = smov 0  }
  0x27 LB: > { %4245 = sst [smem:[#allocation23_spill]] %s3575_s1  ;;  %s3722_s26 = sadd.s32 4294967295, %s3607_s25   ;;  %s3607_s25 = sphi %s3694_s25, %s39_s25   ;;  %s3603_s24 = sphi %s3692_s24, %s4294_s24   ;;  %s3599_s23 = sphi %s3690_s23, %s4293_s23   ;;  %s3595_s22 = sphi %s3688_s22, %s4286_s22   ;;  %s3591_s21 = sphi %s3686_s21, %s4292_s21   ;;  %s3587_s20 = sphi %s3684_s20, %s4291_s20   ;;  %s3583_s19 = sphi %s3682_s19, %s4290_s19   ;;  %s3579_s18 = sphi %s3680_s18, %s4289_s18   ;;  %s3575_s1 = sphi %s3678_s1, %s4288_s1  }
  0x28   : > { %4246 = sst [smem:[#allocation24_spill]] %s3595_s22  ;;  %s2543_s27 = sadd.s32 4294967294, %s3607_s25  }
  0x29   : > { %p107_p10 = scmp.ne.s32.totalorder %s3591_s21, %s3587_s20  ;;  %p4232_p11 = scmp.eq.s32.totalorder %s3722_s26, 0 }
  0x2a   : > { %p133_p12 = scmp.ne.s32.totalorder %s3579_s18, %s3575_s1  ;;  %p252_p1 = scmp.eq.s32.totalorder %s2543_s27, 1 }
  0x2b   : > { %p3732_p0 = por %p4232_p11, %p107_p10  ;;  %p2544_p3 = scmp.ge.s32.totalorder %s3607_s25, 1 }
  0x2c   : > { %p3738_p2 = por %p133_p12, %p4232_p11  ;;  %p3743_p4 = por %p252_p1, %p133_p12 }
  0x2d   : > { %s4247_s28 = scalar_select %p3732_p0, 1, 0 }
  0x2e   : > { %s4248_s29 = scalar_select %p3738_p2, 1, 0 }
  0x2f   : > { %s4249_s30 = scalar_select %p3743_p4, 1, 0 }
  0x30   : > { %p259_p5 = scmp.lt.s32.totalorder %s3607_s25, 3  ;;  %s3611_s11 = smov [#allocation11]  }
  0x31   : > { %4250 = sst [smem:[#allocation25_spill]] %s4249_s30  ;;  %s271_s12 = sshll.u32 %s3611_s11, 4  ;;  %s272_s12 = int_to_ptr.vmem [resolvable:$true] %s271_s12 }
  0x32   : > { %p3748_p6 = pnand %p2544_p3, %p259_p5  ;;  %s3612_s14 = smov [#allocation12]  }
  0x33   : > { %s284_s15 = sshll.u32 %s3612_s14, 4  ;;  %s3392_s16 = scalar_lea.vmem %s272_s12, 1024  ;;  %s285_s15 = int_to_ptr.vmem [resolvable:$true] %s284_s15 }
  0x34   : > { %s4251_s10 = scalar_select %p3748_p6, 1, 0 }
  0x35   : > { %p3183_p7 = pneg %p3748_p6  ;;  %p3393_p12 = scmp.ne.s32.totalorder %s272_s12, %s3392_s16 }
  0x36   : > { %p3400_p5 = scmp.lt.s32.totalorder %s272_s12, %s272_s12  ;;  %p3401_p8 = scmp.lt.s32.totalorder %s3392_s16, %s3392_s16 }
  0x37   : > { %p3757_p9 = pnand %p3183_p7, %p4232_p11 }
  0x38   : > { %p3402_p13 = por %p3401_p8, %p3400_p5 }
  0x39   : > { %p3383_p10 = pneg %p3757_p9 }
  0x3b   : > { %p3395_p1 = pnand %p3393_p12, %p3383_p10 }
  0x3d   : > { %p3396_p3 = pneg %p3395_p1 }
  0x3f   : > { %p3403_p7 = pnand %p3402_p13, %p3396_p3 }
  0x41   : > { %3406 = shalt.err (!%p3403_p7)
}
  0x42   : > { %s4224_s17 = smov 64   ;;  %s4226_s0 = smov 4  }
  0x43   : > { %s4253_s6 = sld [smem:[#allocation30_spill]]  ;;  %s3418_s11 = scalar_lea.vmem %s285_s15, 1024 }
  0x44   : > { %p3419_p12 = scmp.ne.s32.totalorder %s285_s15, %s3418_s11  ;;  %p3426_p13 = scmp.lt.s32.totalorder %s285_s15, %s285_s15 }
  0x45   : > { %p3427_p3 = scmp.lt.s32.totalorder %s3418_s11, %s3418_s11 }
  0x46   : > { %p3421_p1 = pnand %p3419_p12, %p3383_p10 }
  0x47   : > { %p3428_p5 = por %p3427_p3, %p3426_p13 }
  0x48   : > { %p3422_p8 = pneg %p3421_p1 }
  0x49   : > { %3186 = dma.hbm_to_vmem [thread:$0]  (!%p3757_p9), %s4253_s6, 1024, %s272_s12, [#allocation10], %s4224_s17, %s4224_s17, %s4226_s0  }
  0x4a   : > { %p3429_p7 = pnand %p3428_p5, %p3422_p8 }
  0x4c   : > { %3432 = shalt.err (!%p3429_p7)
}
  0x4d   : > { %s4254_s7 = sld [smem:[#allocation31_spill]]  ;;  %s51_s12 = sadd.s32 1, %s3603_s24 }
  0x4e   : > { %s88_s13 = sld [smem:[#allocation5 + %s3603_s24]]  ;;  %p53_p10 = scmp.ge.s32.totalorder %s51_s12, 2 }
  0x4f   : > { %s94_s20 = sadd.s32 1, %s3595_s22  ;;  %p101_p12 = scmp.ne.s32.totalorder %s3595_s22, %s3591_s21 }
  0x50   : > { %p102_p1 = scmp.eq.s32.totalorder %s3607_s25, 0  ;;  %s4296_s12 = smov (%p53_p10, %s51_s12), 0 }
  0x51   : > { %4255 = sst [smem:[#allocation26_spill]] %s4296_s12  ;;  %s320_s11 = sand.u32 1, %s3595_s22  }
  0x52   : > { %p3795_p8 = por %p102_p1, %p101_p12  ;;  %s2548_s14 = sshll.u32 %s320_s11, 8 }
  0x53   : > { %3189 = dma.hbm_to_vmem [thread:$0]  (!%p3757_p9), %s4254_s7, 1024, %s285_s15, [#allocation13], %s4224_s17, %s4224_s17, %s4226_s0  }
  0x54   : > { %p4233_p9 = scmp.lt.s32.totalorder %s3607_s25, 2  ;;  %s90_s15 = sld [smem:[#allocation5 + %s4296_s12]] }
  0x55   : > { %s3171_s17 = scalar_select %p3795_p8, [#allocation5], [#allocation15] }
  0x56   : > { %p3806_p13 = pnand %p4233_p9, %p3795_p8  ;;  %s324_s7 = scalar_lea.vmem [#allocation6], %s2548_s14 }
  0x57   : > { %s3172_s0 = scalar_select %p3795_p8, %s3603_s24, 0 }
  0x58   : > { %s4298_s17 = smov (!%p4233_p9, %s3171_s17), [#allocation16]  ;;  %s333_s30 = sshll.u32 %s324_s7, 4  ;;  %s3817_s30 = int_to_ptr.vmem [resolvable:$true] %s333_s30 }
  0x59   : > { %s4300_s0 = smov (!%p4233_p9, %s3172_s0), 0  ;;  %s117_s8 = ssub.s32 %s3603_s24, %s4296_s12 }
  0x5a   : > { %s91_s6 = ssub.s32 %s88_s13, %s90_s15  ;;  %s326_s9 = sld [smem:[%s4298_s17 + %s4300_s0]] }
  0x5b   : > { %p92_p3 = scmp.eq.s32.totalorder %s91_s6, 0  ;;  %p118_p5 = scmp.eq.s32.totalorder %s117_s8, 0 }
  0x5c   : > { %s120_s27 = sadd.s32 1, %s3583_s19  ;;  %p127_p7 = scmp.ne.s32.totalorder %s3583_s19, %s3579_s18 }
  0x5d   : > { %s3822_s1 = scalar_select %p92_p3, %s3595_s22, %s94_s20  }
  0x5e   : > { %s3830_s2 = scalar_select %p118_p5, %s3583_s19, %s120_s27  }
  0x5f   : > { %4258 = sst [smem:[#allocation27_spill]] %s3822_s1  ;;  %p3834_p10 = por %p127_p7, %p102_p1 }
  0x60   : > { %p4260_p12 = scmp.eq.s32.totalorder %s3722_s26, 1  ;;  %s2669_s7 = sshll.u32 %s326_s9, 12 }
  0x61   : > { %s4259_s13 = scalar_select %p3834_p10, 1, 0 }
  0x62   : > { %p3840_p8 = por %p4260_p12, %p127_p7  ;;  %s4262_s3 = sld [smem:[#allocation29_spill]] }
  0x63   : > { %s3850_s0 = scalar_lea.sflag [#allocation7], %s320_s11  ;;  %p3435_p3 = pneg %p3806_p13 }
  0x64   : > { %s4261_s6 = scalar_select %p3840_p8, 1, 0 }
  0x68   : > { %s3848_s8 = scalar_lea.hbm %s4262_s3, %s2669_s7  ;;  %s3438_s9 = scalar_lea.hbm %s4262_s3, 4096 }
  0x69   : > { %s3433_s14 = scalar_lea.hbm %s3848_s8, 4096  ;;  %p3439_p12 = scmp.lt.s32.totalorder %s3848_s8, %s4262_s3 }
  0x6a   : > { %p3434_p1 = scmp.ne.s32.totalorder %s3848_s8, %s3433_s14  ;;  %p3440_p11 = scmp.lt.s32.totalorder %s3438_s9, %s3433_s14 }
  0x6c   : > { %p3436_p5 = pnand %p3435_p3, %p3434_p1  ;;  %p3441_p9 = por %p3440_p11, %p3439_p12 }
  0x6e   : > { %p3437_p7 = pneg %p3436_p5 }
  0x70   : > { %p3442_p4 = pnand %p3441_p9, %p3437_p7 }
  0x72   : > { %3445 = shalt.err (!%p3442_p4)
}
  0x73   : > { %s3446_s11 = scalar_lea.vmem %s3817_s30, 4096  ;;  %s3615_s7 = smov [#allocation6]  }
  0x74   : > { %p3447_p8 = scmp.ne.s32.totalorder %s3817_s30, %s3446_s11  ;;  %s3451_s15 = sshll.u32 %s3615_s7, 4  ;;  %s3452_s15 = int_to_ptr.vmem [resolvable:$false] %s3451_s15 }
  0x75   : > { %s3453_s12 = scalar_lea.vmem %s3452_s15, 8192  ;;  %p3454_p5 = scmp.lt.s32.totalorder %s3817_s30, %s3452_s15 }
  0x76   : > { %p3449_p2 = pnand %p3447_p8, %p3435_p3  ;;  %p3455_p0 = scmp.lt.s32.totalorder %s3453_s12, %s3446_s11 }
  0x78   : > { %p3450_p1 = pneg %p3449_p2  ;;  %p3456_p6 = por %p3455_p0, %p3454_p5 }
  0x7a   : > { %p3457_p10 = pnand %p3456_p6, %p3450_p1 }
  0x7c   : > { %3460 = shalt.err (!%p3457_p10)
}
  0x7d   : > { %s4263_s1 = smov 4   ;;  %s4264_s20 = smov 64  }
  0x7e   : > { %3195 = dma.hbm_to_vmem [thread:$0]  (!%p3806_p13), %s3848_s8, 4096, %s3817_s30, %s3850_s0, %s4264_s20, %s4264_s20, %s4263_s1  }
  0x7f   : > { %s345_s17 = sand.u32 1, %s3583_s19   ;;  %s2670_s14 = sshll.u32 %s3603_s24, 11 }
  0x80   : > { %s2551_s27 = sshll.u32 %s345_s17, 7  ;;  %s353_s7 = scalar_lea.hbm %s4217_s4, %s2670_s14 }
  0x81   : > { %p4265_p11 = scmp.ne.s32.totalorder %s4259_s13, 0  ;;  %p4266_p0 = scmp.lt.s32.totalorder %s3607_s25, 2 }
  0x82   : > { %s347_s15 = scalar_lea.vmem [#allocation9], %s2551_s27  ;;  %s4268_s3 = sand.u32 1, %s3607_s25  }
  0x83   : > { %p3883_p2 = pnand %p4266_p0, %p4265_p11  ;;  %s354_s12 = sshll.u32 %s347_s15, 4  ;;  %s355_s12 = int_to_ptr.vmem [resolvable:$true] %s354_s12 }
  0x84   : > { %s344_s22 = scalar_lea.sflag [#allocation10], %s4268_s3  ;;  %s3474_s30 = scalar_lea.vmem %s355_s12, 2048 }
  0x85   : > { %p3463_p4 = pneg %p3883_p2  ;;  %p3475_p6 = scmp.ne.s32.totalorder %s355_s12, %s3474_s30 }
  0x86   : > { %s3616_s8 = smov [#allocation9]  }
  0x87   : > { %p3477_p9 = pnand %p3475_p6, %p3463_p4  ;;  %s3479_s0 = sshll.u32 %s3616_s8, 4  ;;  %s3480_s0 = int_to_ptr.vmem [resolvable:$false] %s3479_s0 }
  0x88   : > { %s3481_s13 = scalar_lea.vmem %s3480_s0, 4096  ;;  %p3482_p10 = scmp.lt.s32.totalorder %s355_s12, %s3480_s0 }
  0x89   : > { %p3478_p13 = pneg %p3477_p9  ;;  %p3483_p8 = scmp.lt.s32.totalorder %s3481_s13, %s3474_s30 }
  0x8b   : > { %p3484_p3 = por %p3483_p8, %p3482_p10 }
  0x8d   : > { %p3485_p7 = pnand %p3484_p3, %p3478_p13 }
  0x8f   : > { %3488 = shalt.err (!%p3485_p7)
}
  0x90   : > { %3198 = dma.hbm_to_vmem [thread:$0]  (!%p3883_p2), %s353_s7, 2048, %s355_s12, %s344_s22, %s4264_s20, %s4264_s20, %s4263_s1  }
  0x91   : > { %p4269_p12 = scmp.ne.s32.totalorder %s4251_s10, 0 }
  0x92   : > { %s377_s3 = sand.u32 (!%p4269_p12), 1, %s3591_s21   ;;  %p4270_p1 = scmp.ne.s32.totalorder (!%p4269_p12), %s4247_s28, 0 }
  0x93   : > { %375 = sbr.rel (%p4269_p12) target bundleno = 955 (0x3bb), region = 48  ;;  %s2555_s17 = sshll.u32 (!%p4269_p12), %s377_s3, 8 }
  0x94   : > { %s378_s14 = scalar_lea.sflag (!%p4269_p12), [#allocation7], %s377_s3  ;;  %s3899_s27 = scalar_lea.vmem (!%p4269_p12), [#allocation6], %s2555_s17 }
  0x98   : > { %3554 = dma.done.wait (%p4270_p1), %s378_s14, 4096  }
  0x99   : > { %3556 = vsyncadd (%p4270_p1), %s378_s14, 4294963200  ;;  %s386_s22 = sand.u32 1, %s3722_s26   ;;  %s388_s1 = sand.u32 1, %s3579_s18  }
  0x9a   : > { %s3909_s10 = sshll.u32 %s388_s1, 7  ;;  %s387_s20 = scalar_lea.sflag [#allocation10], %s386_s22 }
  0x9b   : > { %s3912_s9 = scalar_lea.vmem [#allocation9], %s3909_s10  ;;  %p4271_p5 = scmp.ne.s32.totalorder %s4248_s29, 0 }
  0x9d   : > { %3558 = dma.done.wait (%p4271_p5), %s387_s20, 2048  }
  0x9e   : > { %3560 = vsyncadd (%p4271_p5), %s387_s20, 4294965248  ;;  %p4272_p11 = scmp.eq.s32.totalorder %s3722_s26, 0 }
  0xa0   : > { %3562 = dma.done.wait (%p4272_p11), [#allocation10], 1024   ;;  %p4273_p0 = pmov %p4272_p11 }
  0xa2   : > { %3564 = vsyncadd (%p4273_p0), [#allocation10], 4294966272  ;;  %p4274_p2 = pmov %p4273_p0 }
  0xa3   : > { %p4275_p4 = pmov %p4273_p0 }
  0xa4   : > { %3566 = dma.done.wait (%p4274_p2), [#allocation13], 1024  }
  0xa5   : > { %3568 = vsyncadd (%p4275_p4), [#allocation13], 4294966272  ;;  %s2560_s28 = sshll.u32 %s3599_s23, 3  ;;  %s3928_s11 = sld [smem:[#allocation5 + %s3599_s23]]  ;;  %v3617_v0 = vmov 0.0  }
  0xa6   : > { %p3932_p6 = scmp.lt.s32.totalorder %s2560_s28, 15  ;;  %483 = vst [vmem:[#allocation2 + $0xb0] sm:$0xff] %v3617_v0  ;;  %484 = vst [vmem:[#allocation2] sm:$0xff] %v3617_v0  ;;  %s516_s26 = sld [smem:[#allocation4 + %s3599_s23]] }
  0xa7   : > { %485 = vst [vmem:[#allocation2 + $0xd8] sm:$0xff] %v3617_v0  ;;  %486 = vst [vmem:[#allocation2 + $0x18] sm:$0xff] %v3617_v0  ;;  %s2564_s7 = sshll.u32 %s3599_s23, 5  ;;  %s4277_s22 = sld [smem:[#allocation28_spill]] }
  0xa8   : > { %487 = vst [vmem:[#allocation2 + $0x50] sm:$0xff] %v3617_v0  ;;  %488 = vst [vmem:[#allocation2 + $0x68] sm:$0xff] %v3617_v0  ;;  %p472_p9 = scmp.lt.s32.totalorder %s2564_s7, 63  ;;  %s4302_s28 = smov (!%p3932_p6, %s2560_s28), 15 }
  0xa9   : > { %489 = vst [vmem:[#allocation2 + $0x30] sm:$0xff] %v3617_v0  ;;  %490 = vst [vmem:[#allocation2 + $0x48] sm:$0xff] %v3617_v0  ;;  %s2562_s12 = sshll.u32 %s4302_s28, 2  ;;  %s3954_s29 = scalar_lea.vmem [#allocation14], %s3909_s10 }
  0xaa   : > { %491 = vst [vmem:[#allocation2 + $0x80] sm:$0xff] %v3617_v0  ;;  %492 = vst [vmem:[#allocation2 + $0x88] sm:$0xff] %v3617_v0  ;;  %s4304_s7 = smov (!%p472_p9, %s2564_s7), 63 }
  0xab   : > { %493 = vst [vmem:[#allocation2 + $0xe8] sm:$0xff] %v3617_v0  ;;  %494 = vst [vmem:[#allocation2 + $0xb8] sm:$0xff] %v3617_v0  ;;  %s2561_s16 = sshll.u32 %s3928_s11, 2  ;;  %s2565_s15 = sshll.u32 %s4304_s7, 3 }
  0xac   : > { %495 = vst [vmem:[#allocation2 + $0x60] sm:$0xff] %v3617_v0  ;;  %496 = vst [vmem:[#allocation2 + $0xf0] sm:$0xff] %v3617_v0  ;;  %p457_p13 = scmp.lt.s32.totalorder %s2561_s16, 3  ;;  %s3946_s0 = scalar_lea.vmem %s4218_s5, %s2565_s15 }
  0xad   : > { %497 = vst [vmem:[#allocation2 + $0x8] sm:$0xff] %v3617_v0  ;;  %498 = vst [vmem:[#allocation2 + $0x78] sm:$0xff] %v3617_v0  ;;  %p2566_p10 = scmp.le.s32.totalorder %s516_s26, 0 }
  0xae   : > { %499 = vst [vmem:[#allocation2 + $0x38] sm:$0xff] %v3617_v0  ;;  %500 = vst [vmem:[#allocation2 + $0x58] sm:$0xff] %v3617_v0  ;;  %s4306_s16 = smov (!%p457_p13, %s2561_s16), 3 }
  0xaf   : > { %501 = vst [vmem:[#allocation2 + $0x40] sm:$0xff] %v3617_v0  ;;  %502 = vst [vmem:[#allocation2 + $0xc8] sm:$0xff] %v3617_v0  ;;  %s460_s13 = sadd.s32 %s2562_s12, %s4306_s16 }
  0xb0   : > { %503 = vst [vmem:[#allocation2 + $0xe0] sm:$0xff] %v3617_v0  ;;  %504 = vst [vmem:[#allocation2 + $0x90] sm:$0xff] %v3617_v0  ;;  %s2563_s3 = sshll.u32 %s460_s13, 3 }
  0xb1   : > { %505 = vst [vmem:[#allocation2 + $0x70] sm:$0xff] %v3617_v0  ;;  %506 = vst [vmem:[#allocation2 + $0xc0] sm:$0xff] %v3617_v0  ;;  %s3951_s20 = scalar_lea.vmem %s4277_s22, %s2563_s3  ;;  %520 = sbr.rel (%p2566_p10) target bundleno = 543 (0x21f), region = 72 }
  0xb2   : > { %507 = vst [vmem:[#allocation2 + $0xa8] sm:$0xff] %v3617_v0  ;;  %508 = vst [vmem:[#allocation2 + $0xd0] sm:$0xff] %v3617_v0 }
  0xb3   : > { %509 = vst [vmem:[#allocation2 + $0x10] sm:$0xff] %v3617_v0  ;;  %510 = vst [vmem:[#allocation2 + $0x28] sm:$0xff] %v3617_v0 }
  0xb4   : > { %511 = vst [vmem:[#allocation2 + $0xa0] sm:$0xff] %v3617_v0  ;;  %512 = vst [vmem:[#allocation2 + $0xf8] sm:$0xff] %v3617_v0 }
  0xb5   : > { %513 = vst [vmem:[#allocation2 + $0x20] sm:$0xff] %v3617_v0  ;;  %514 = vst [vmem:[#allocation2 + $0x98] sm:$0xff] %v3617_v0 }
  0xb6   : > { %v3291_v1 = vld [vmem:[%s3899_s27 + $0x78] sm:$0xff]   ;;  %v3295_v5 = vld [vmem:[%s3899_s27 + $0x70] sm:$0xff]   ;;  %v3299_v9 = vld [vmem:[%s3899_s27 + $0x68] sm:$0xff]  }
  0xb7   : > { %v3292_v2 = vld [vmem:[%s3899_s27 + $0xf8] sm:$0xff]   ;;  %2799 = vmatprep.subr.bf16.mxu0 %v3291_v1  ;;  %v3296_v6 = vld [vmem:[%s3899_s27 + $0xf0] sm:$0xff]   ;;  %v3300_v10 = vld [vmem:[%s3899_s27 + $0xe8] sm:$0xff]  }
  0xb8   : > { %v3293_v3 = vld [vmem:[%s3899_s27 + $0x38] sm:$0xff]   ;;  %2911 = vmatprep.subr.bf16.mxu1 %v3292_v2  ;;  %v3297_v7 = vld [vmem:[%s3899_s27 + $0x30] sm:$0xff]   ;;  %v3301_v11 = vld [vmem:[%s3899_s27 + $0x28] sm:$0xff]  }
  0xb9   : > { %v3294_v4 = vld [vmem:[%s3899_s27 + $0xb8] sm:$0xff]   ;;  %2800 = vmatpush3.bf16.msra.mxu0 %v3293_v3  ;;  %v3298_v8 = vld [vmem:[%s3899_s27 + $0xb0] sm:$0xff]   ;;  %v3302_v12 = vld [vmem:[%s3899_s27 + $0xa8] sm:$0xff]  }
  0xba   : > { %2912 = vmatpush3.bf16.msra.mxu1 %v3294_v4  ;;  %2801 = vmatprep.subr.bf16.mxu0 %v3295_v5  ;;  %v3303_v13 = vld [vmem:[%s3899_s27 + $0x60] sm:$0xff]   ;;  %v3307_v17 = vld [vmem:[%s3899_s27 + $0x58] sm:$0xff]   ;;  %v3311_v21 = vld [vmem:[%s3899_s27 + $0x50] sm:$0xff]  }
  0xbb   : > { %2913 = vmatprep.subr.bf16.mxu1 %v3296_v6  ;;  %v3304_v14 = vld [vmem:[%s3899_s27 + $0xe0] sm:$0xff]   ;;  %v3308_v18 = vld [vmem:[%s3899_s27 + $0xd8] sm:$0xff]   ;;  %v3312_v22 = vld [vmem:[%s3899_s27 + $0xd0] sm:$0xff]  }
  0xbc   : > { %v3305_v15 = vld [vmem:[%s3899_s27 + $0x20] sm:$0xff]   ;;  %v3309_v19 = vld [vmem:[%s3899_s27 + $0x18] sm:$0xff]   ;;  %v3313_v23 = vld [vmem:[%s3899_s27 + $0x10] sm:$0xff]  }
  0xbd   : > { %2802 = vmatpush3.bf16.msra.mxu0 %v3297_v7  ;;  %v3306_v16 = vld [vmem:[%s3899_s27 + $0xa0] sm:$0xff]   ;;  %v3310_v20 = vld [vmem:[%s3899_s27 + $0x98] sm:$0xff]   ;;  %v3314_v24 = vld [vmem:[%s3899_s27 + $0x90] sm:$0xff]  }
  0xbe   : > { %2914 = vmatpush3.bf16.msra.mxu1 %v3298_v8  ;;  %2803 = vmatprep.subr.bf16.mxu0 %v3299_v9  ;;  %v3315_v25 = vld [vmem:[%s3899_s27 + $0x48] sm:$0xff]   ;;  %v3319_v29 = vld [vmem:[%s3899_s27 + $0x40] sm:$0xff]   ;;  %v524_v34 = vld [vmem:[%s3951_s20 + $0x18] sm:$0xff] }
  0xbf   : > { %2915 = vmatprep.subr.bf16.mxu1 %v3300_v10  ;;  %v3316_v26 = vld [vmem:[%s3899_s27 + $0xc8] sm:$0xff]   ;;  %v3320_v30 = vld [vmem:[%s3899_s27 + $0xc0] sm:$0xff]   ;;  %v556_v38 = vunpack.c.l.s8.bf16 %v524_v34  ;;  %v560_v39 = vunpack.c.h.s8.bf16 %v524_v34  ;;  %v523_v40 = vld [vmem:[%s3951_s20 + $0x10] sm:$0xff] }
  0xc0   : > { %v3317_v27 = vld [vmem:[%s3899_s27 + $0x8] sm:$0xff]   ;;  %v3321_v31 = vld [vmem:[%s3899_s27] sm:$0xff]   ;;  %v555_v42 = vunpack.c.l.s8.bf16 %v523_v40  ;;  %v528_v44 = vld [vmem:[%s3951_s20 + $0x38] sm:$0xff]  ;;  %v559_v46 = vunpack.c.h.s8.bf16 %v523_v40 }
  0xc1   : > { %2804 = vmatpush3.bf16.msra.mxu0 %v3301_v11  ;;  %v3318_v28 = vld [vmem:[%s3899_s27 + $0x88] sm:$0xff]   ;;  %v3322_v32 = vld [vmem:[%s3899_s27 + $0x80] sm:$0xff]   ;;  %1098 = vmatprep.mubr.bf16.mxu1 %v556_v38  ;;  %v564_v48 = vunpack.c.l.s8.bf16 %v528_v44  ;;  %v527_v50 = vld [vmem:[%s3951_s20 + $0x30] sm:$0xff]  ;;  %v568_v54 = vunpack.c.h.s8.bf16 %v528_v44 }
  0xc2   : > { %2916 = vmatpush3.bf16.msra.mxu1 %v3302_v12  ;;  %2805 = vmatprep.subr.bf16.mxu0 %v3303_v13  ;;  %v522_v33 = vld [vmem:[%s3951_s20 + $0x8] sm:$0xff]  ;;  %v521_v35 = vld [vmem:[%s3951_s20] sm:$0xff]  ;;  %v563_v52 = vunpack.c.l.s8.bf16 %v527_v50  ;;  %v532_v56 = vld [vmem:[%s3951_s20 + $0x58] sm:$0xff]  ;;  %v567_v58 = vunpack.c.h.s8.bf16 %v527_v50 }
  0xc3   : > { %2917 = vmatprep.subr.bf16.mxu1 %v3304_v14  ;;  %v554_v36 = vunpack.c.l.s8.bf16 %v522_v33  ;;  %v558_v37 = vunpack.c.h.s8.bf16 %v522_v33  ;;  %v553_v41 = vunpack.c.l.s8.bf16 %v521_v35  ;;  %v526_v43 = vld [vmem:[%s3951_s20 + $0x28] sm:$0xff]  ;;  %v557_v45 = vunpack.c.h.s8.bf16 %v521_v35  ;;  %v525_v49 = vld [vmem:[%s3951_s20 + $0x20] sm:$0xff]  ;;  %v531_v62 = vld [vmem:[%s3951_s20 + $0x50] sm:$0xff] }
  0xc4   : > { %v562_v47 = vunpack.c.l.s8.bf16 %v526_v43  ;;  %v561_v51 = vunpack.c.l.s8.bf16 %v525_v49  ;;  %v566_v53 = vunpack.c.h.s8.bf16 %v526_v43  ;;  %v530_v55 = vld [vmem:[%s3951_s20 + $0x48] sm:$0xff]  ;;  %v565_v57 = vunpack.c.h.s8.bf16 %v525_v49  ;;  %v529_v61 = vld [vmem:[%s3951_s20 + $0x40] sm:$0xff]  ;;  %v536_v4 = vld [vmem:[%s3951_s20 + $0x78] sm:$0xff] }
  0xc5   : > { %2806 = vmatpush3.bf16.msra.mxu0 %v3305_v15  ;;  %937 = vmatprep.mubr.bf16.mxu0 %v554_v36  ;;  %v570_v59 = vunpack.c.l.s8.bf16 %v530_v55  ;;  %v572_v60 = vunpack.c.l.s8.bf16 %v532_v56  ;;  %v569_v63 = vunpack.c.l.s8.bf16 %v529_v61  ;;  %v571_v0 = vunpack.c.l.s8.bf16 %v531_v62  ;;  %v534_v3 = vld [vmem:[%s3951_s20 + $0x68] sm:$0xff]  ;;  %v533_v9 = vld [vmem:[%s3951_s20 + $0x60] sm:$0xff]  ;;  %v535_v10 = vld [vmem:[%s3951_s20 + $0x70] sm:$0xff] }
  0xc6   : > { %2918 = vmatpush3.bf16.msra.mxu1 %v3306_v16  ;;  %2807 = vmatprep.subr.bf16.mxu0 %v3307_v17  ;;  %v574_v1 = vunpack.c.h.s8.bf16 %v530_v55  ;;  %v576_v2 = vunpack.c.h.s8.bf16 %v532_v56  ;;  %v573_v5 = vunpack.c.h.s8.bf16 %v529_v61  ;;  %v575_v6 = vunpack.c.h.s8.bf16 %v531_v62  ;;  %v538_v15 = vld [vmem:[%s3951_s20 + $0x88] sm:$0xff]  ;;  %v540_v16 = vld [vmem:[%s3951_s20 + $0x98] sm:$0xff]  ;;  %v541_v33 = vld [vmem:[%s3951_s20 + $0xa0] sm:$0xff] }
  0xc7   : > { %2919 = vmatprep.subr.bf16.mxu1 %v3308_v18  ;;  %v578_v7 = vunpack.c.l.s8.bf16 %v534_v3  ;;  %v580_v8 = vunpack.c.l.s8.bf16 %v536_v4  ;;  %v577_v11 = vunpack.c.l.s8.bf16 %v533_v9  ;;  %v579_v12 = vunpack.c.l.s8.bf16 %v535_v10  ;;  %v543_v34 = vld [vmem:[%s3951_s20 + $0xb0] sm:$0xff]  ;;  %v548_v40 = vld [vmem:[%s3951_s20 + $0xd8] sm:$0xff] }
  0xc8   : > { %v582_v13 = vunpack.c.h.s8.bf16 %v534_v3  ;;  %v584_v14 = vunpack.c.h.s8.bf16 %v536_v4  ;;  %v581_v17 = vunpack.c.h.s8.bf16 %v533_v9  ;;  %v583_v18 = vunpack.c.h.s8.bf16 %v535_v10 }
  0xc9   : > { %2808 = vmatpush3.bf16.msra.mxu0 %v3309_v19  ;;  %v586_v19 = vunpack.c.l.s8.bf16 %v538_v15  ;;  %v593_v35 = vunpack.c.l.s8.bf16 %v541_v33  ;;  %v595_v36 = vunpack.c.l.s8.bf16 %v543_v34  ;;  %v604_v44 = vunpack.c.l.s8.bf16 %v548_v40 }
  0xca   : > { %2920 = vmatpush3.bf16.msra.mxu1 %v3310_v20  ;;  %2809 = vmatprep.subr.bf16.mxu0 %v3311_v21  ;;  %v588_v20 = vunpack.c.l.s8.bf16 %v540_v16  ;;  %v537_v21 = vld [vmem:[%s3951_s20 + $0x80] sm:$0xff]  ;;  %v608_v50 = vunpack.c.h.s8.bf16 %v548_v40 }
  0xcb   : > { %2921 = vmatprep.subr.bf16.mxu1 %v3312_v22  ;;  %v539_v22 = vld [vmem:[%s3951_s20 + $0x90] sm:$0xff] }
  0xcd   : > { %2810 = vmatpush3.bf16.msra.mxu0 %v3313_v23  ;;  %v585_v23 = vunpack.c.l.s8.bf16 %v537_v21 }
  0xce   : > { %2922 = vmatpush3.bf16.msra.mxu1 %v3314_v24  ;;  %2811 = vmatprep.subr.bf16.mxu0 %v3315_v25  ;;  %v587_v24 = vunpack.c.l.s8.bf16 %v539_v22  ;;  %v590_v25 = vunpack.c.h.s8.bf16 %v538_v15 }
  0xcf   : > { %2923 = vmatprep.subr.bf16.mxu1 %v3316_v26  ;;  %v592_v26 = vunpack.c.h.s8.bf16 %v540_v16  ;;  %v618_v16 = vld [vmem:[#allocation2] sm:$0xff] }
  0xd1   : > { %2812 = vmatpush3.bf16.msra.mxu0 %v3317_v27  ;;  %v542_v27 = vld [vmem:[%s3951_s20 + $0xa8] sm:$0xff] }
  0xd2   : > { %2924 = vmatpush3.bf16.msra.mxu1 %v3318_v28  ;;  %2813 = vmatprep.subr.bf16.mxu0 %v3319_v29  ;;  %v544_v28 = vld [vmem:[%s3951_s20 + $0xb8] sm:$0xff]  ;;  %v589_v29 = vunpack.c.h.s8.bf16 %v537_v21 }
  0xd3   : > { %2925 = vmatprep.subr.bf16.mxu1 %v3320_v30  ;;  %v591_v30 = vunpack.c.h.s8.bf16 %v539_v22  ;;  %v600_v38 = vunpack.c.h.s8.bf16 %v544_v28 }
  0xd5   : > { %2814 = vmatpush3.bf16.msra.mxu0 %v3321_v31  ;;  %v594_v31 = vunpack.c.l.s8.bf16 %v542_v27 }
  0xd6   : > { %2926 = vmatpush3.bf16.msra.mxu1 %v3322_v32  ;;  %v596_v32 = vunpack.c.l.s8.bf16 %v544_v28 }
  0xd8   : > { %938 = vmatmul.mubr.bf16.vlgmr.msra.gmra.mxu0 %v553_v41  ;;  %v597_v41 = vunpack.c.h.s8.bf16 %v541_v33 }
  0xd9   : > { %1099 = vmatmul.mubr.bf16.vlgmr.msra.gmra.mxu1 %v555_v42  ;;  %945 = vmatprep.mubr.bf16.mxu0 %v558_v37  ;;  %v598_v37 = vunpack.c.h.s8.bf16 %v542_v27  ;;  %v599_v42 = vunpack.c.h.s8.bf16 %v543_v34  ;;  %v620_v34 = vld [vmem:[#allocation2 + $0x18] sm:$0xff] }
  0xda   : > { %1106 = vmatprep.mubr.bf16.mxu1 %v560_v39  ;;  %v546_v39 = vld [vmem:[%s3951_s20 + $0xc8] sm:$0xff] }
  0xdb   : > { %v602_v43 = vunpack.c.l.s8.bf16 %v546_v39  ;;  %v606_v49 = vunpack.c.h.s8.bf16 %v546_v39 }
  0xe0   : > { %946 = vmatmul.mubr.bf16.gmra.mxu0 %v557_v45  ;;  %v545_v45 = vld [vmem:[%s3951_s20 + $0xc0] sm:$0xff] }
  0xe1   : > { %1107 = vmatmul.mubr.bf16.gmra.mxu1 %v559_v46  ;;  %953 = vmatprep.mubr.bf16.mxu0 %v562_v47  ;;  %v547_v46 = vld [vmem:[%s3951_s20 + $0xd0] sm:$0xff]  ;;  %v601_v47 = vunpack.c.l.s8.bf16 %v545_v45 }
  0xe2   : > { %1114 = vmatprep.mubr.bf16.mxu1 %v564_v48  ;;  %v603_v48 = vunpack.c.l.s8.bf16 %v547_v46 }
  0xe8   : > { %954 = vmatmul.mubr.bf16.gmra.mxu0 %v561_v51  ;;  %v550_v51 = vld [vmem:[%s3951_s20 + $0xe8] sm:$0xff] }
  0xe9   : > { %1115 = vmatmul.mubr.bf16.gmra.mxu1 %v563_v52  ;;  %961 = vmatprep.mubr.bf16.mxu0 %v566_v53  ;;  %v552_v52 = vld [vmem:[%s3951_s20 + $0xf8] sm:$0xff]  ;;  %v605_v53 = vunpack.c.h.s8.bf16 %v545_v45  ;;  %v610_v55 = vunpack.c.l.s8.bf16 %v550_v51  ;;  %v614_v61 = vunpack.c.h.s8.bf16 %v550_v51 }
  0xea   : > { %1122 = vmatprep.mubr.bf16.mxu1 %v568_v54  ;;  %v607_v54 = vunpack.c.h.s8.bf16 %v547_v46  ;;  %v612_v56 = vunpack.c.l.s8.bf16 %v552_v52  ;;  %v616_v62 = vunpack.c.h.s8.bf16 %v552_v52  ;;  %v622_v52 = vld [vmem:[#allocation2 + $0x68] sm:$0xff] }
  0xf0   : > { %962 = vmatmul.mubr.bf16.gmra.mxu0 %v565_v57  ;;  %v549_v57 = vld [vmem:[%s3951_s20 + $0xe0] sm:$0xff] }
  0xf1   : > { %1123 = vmatmul.mubr.bf16.gmra.mxu1 %v567_v58  ;;  %969 = vmatprep.mubr.bf16.mxu0 %v570_v59  ;;  %v551_v58 = vld [vmem:[%s3951_s20 + $0xf0] sm:$0xff]  ;;  %v609_v59 = vunpack.c.l.s8.bf16 %v549_v57 }
  0xf2   : > { %1130 = vmatprep.mubr.bf16.mxu1 %v572_v60  ;;  %v611_v60 = vunpack.c.l.s8.bf16 %v551_v58 }
  0xf8   : > { %970 = vmatmul.mubr.bf16.gmra.mxu0 %v569_v63  ;;  %v613_v63 = vunpack.c.h.s8.bf16 %v549_v57 }
  0xf9   : > { %1131 = vmatmul.mubr.bf16.gmra.mxu1 %v571_v0  ;;  %977 = vmatprep.mubr.bf16.mxu0 %v574_v1  ;;  %v615_v0 = vunpack.c.h.s8.bf16 %v551_v58 }
  0xfa   : > { %1138 = vmatprep.mubr.bf16.mxu1 %v576_v2 }
 0x100   : > { %978 = vmatmul.mubr.bf16.gmra.mxu0 %v573_v5 }
 0x101   : > { %1139 = vmatmul.mubr.bf16.gmra.mxu1 %v575_v6  ;;  %985 = vmatprep.mubr.bf16.mxu0 %v578_v7  ;;  %v617_v7 = vld [vmem:[#allocation2 + $0xb0] sm:$0xff] }
 0x102   : > { %1146 = vmatprep.mubr.bf16.mxu1 %v580_v8 }
 0x108   : > { %986 = vmatmul.mubr.bf16.gmra.mxu0 %v577_v11 }
 0x109   : > { %1147 = vmatmul.mubr.bf16.gmra.mxu1 %v579_v12  ;;  %993 = vmatprep.mubr.bf16.mxu0 %v582_v13 }
 0x10a   : > { %1154 = vmatprep.mubr.bf16.mxu1 %v584_v14 }
 0x110   : > { %994 = vmatmul.mubr.bf16.gmra.mxu0 %v581_v17 }
 0x111   : > { %1155 = vmatmul.mubr.bf16.gmra.mxu1 %v583_v18  ;;  %1001 = vmatprep.mubr.bf16.mxu0 %v586_v19 }
 0x112   : > { %1162 = vmatprep.mubr.bf16.mxu1 %v588_v20 }
 0x118   : > { %1002 = vmatmul.mubr.bf16.gmra.mxu0 %v585_v23 }
 0x119   : > { %1163 = vmatmul.mubr.bf16.gmra.mxu1 %v587_v24  ;;  %1009 = vmatprep.mubr.bf16.mxu0 %v590_v25  ;;  %v619_v25 = vld [vmem:[#allocation2 + $0xd8] sm:$0xff] }
 0x11a   : > { %1170 = vmatprep.mubr.bf16.mxu1 %v592_v26 }
 0x120   : > { %1010 = vmatmul.mubr.bf16.gmra.mxu0 %v589_v29 }
 0x121   : > { %1171 = vmatmul.mubr.bf16.gmra.mxu1 %v591_v30  ;;  %1017 = vmatprep.mubr.bf16.mxu0 %v594_v31 }
 0x122   : > { %1178 = vmatprep.mubr.bf16.mxu1 %v596_v32 }
 0x128   : > { %1018 = vmatmul.mubr.bf16.gmra.mxu0 %v593_v35 }
 0x129   : > { %1179 = vmatmul.mubr.bf16.gmra.mxu1 %v595_v36  ;;  %1025 = vmatprep.mubr.bf16.mxu0 %v598_v37 }
 0x12a   : > { %1186 = vmatprep.mubr.bf16.mxu1 %v600_v38 }
 0x130   : > { %1026 = vmatmul.mubr.bf16.gmra.mxu0 %v597_v41 }
 0x131   : > { %1187 = vmatmul.mubr.bf16.gmra.mxu1 %v599_v42  ;;  %1033 = vmatprep.mubr.bf16.mxu0 %v602_v43  ;;  %v621_v43 = vld [vmem:[#allocation2 + $0x50] sm:$0xff] }
 0x132   : > { %1194 = vmatprep.mubr.bf16.mxu1 %v604_v44 }
 0x138   : > { %1034 = vmatmul.mubr.bf16.gmra.mxu0 %v601_v47 }
 0x139   : > { %1195 = vmatmul.mubr.bf16.gmra.mxu1 %v603_v48  ;;  %1041 = vmatprep.mubr.bf16.mxu0 %v606_v49 }
 0x13a   : > { %1202 = vmatprep.mubr.bf16.mxu1 %v608_v50 }
 0x140   : > { %1042 = vmatmul.mubr.bf16.gmra.mxu0 %v605_v53 }
 0x141   : > { %1203 = vmatmul.mubr.bf16.gmra.mxu1 %v607_v54  ;;  %1049 = vmatprep.mubr.bf16.mxu0 %v610_v55 }
 0x142   : > { %1210 = vmatprep.mubr.bf16.mxu1 %v612_v56 }
 0x148   : > { %1050 = vmatmul.mubr.bf16.gmra.mxu0 %v609_v59 }
 0x149   : > { %1211 = vmatmul.mubr.bf16.gmra.mxu1 %v611_v60  ;;  %1057 = vmatprep.mubr.bf16.mxu0 %v614_v61  ;;  %v623_v61 = vld [vmem:[#allocation2 + $0x30] sm:$0xff] }
 0x14a   : > { %1218 = vmatprep.mubr.bf16.mxu1 %v616_v62 }
 0x150   : > { %1058 = vmatmul.mubr.bf16.gmra.mxu0 %v613_v63 }
 0x151   : > { %1219 = vmatmul.mubr.bf16.gmra.mxu1 %v615_v0 }
 0x198   : > { %v2815_v1 = vpop.f32.mrf.mxu0 }
 0x199   : > { %v2927_v2 = vpop.f32.mrf.mxu1 }
 0x19a   : > { %v2816_v3 = vpop.f32.mrf.mxu0 }
 0x19b   : > { %v2928_v4 = vpop.f32.mrf.mxu1  ;;  %v2817_v5 = vadd.f32 %v2816_v3, %v2815_v1 }
 0x19c   : > { %v2929_v6 = vadd.f32 %v2928_v4, %v2927_v2  ;;  %v2818_v8 = vpop.f32.mrf.mxu0 }
 0x19d   : > { %v2930_v9 = vpop.f32.mrf.mxu1 }
 0x19e   : > { %v1101_v10 = vadd.f32 %v2929_v6, %v2817_v5  ;;  %v2819_v11 = vpop.f32.mrf.mxu0  ;;  %v624_v6 = vld [vmem:[#allocation2 + $0x48] sm:$0xff] }
 0x19f   : > { %v2931_v12 = vpop.f32.mrf.mxu1  ;;  %v2820_v14 = vadd.f32 %v2819_v11, %v2818_v8 }
 0x1a0   : > { %v1227_v13 = vadd.f32 %v1101_v10, %v617_v7  ;;  %v2932_v15 = vadd.f32 %v2931_v12, %v2930_v9  ;;  %v2821_v17 = vpop.f32.mrf.mxu0 }
 0x1a1   : > { %v2933_v18 = vpop.f32.mrf.mxu1 }
 0x1a2   : > { %1259 = vst [vmem:[#allocation2 + $0xb0] sm:$0xff] %v1227_v13  ;;  %v1104_v19 = vadd.f32 %v2932_v15, %v2820_v14  ;;  %v2822_v20 = vpop.f32.mrf.mxu0  ;;  %v625_v15 = vld [vmem:[#allocation2 + $0x80] sm:$0xff] }
 0x1a3   : > { %v2934_v21 = vpop.f32.mrf.mxu1  ;;  %v2823_v23 = vadd.f32 %v2822_v20, %v2821_v17 }
 0x1a4   : > { %v1228_v22 = vadd.f32 %v1104_v19, %v618_v16  ;;  %v2935_v24 = vadd.f32 %v2934_v21, %v2933_v18  ;;  %v2824_v26 = vpop.f32.mrf.mxu0 }
 0x1a5   : > { %v2936_v27 = vpop.f32.mrf.mxu1 }
 0x1a6   : > { %1260 = vst [vmem:[#allocation2] sm:$0xff] %v1228_v22  ;;  %v1109_v28 = vadd.f32 %v2935_v24, %v2823_v23  ;;  %v2825_v29 = vpop.f32.mrf.mxu0  ;;  %v626_v24 = vld [vmem:[#allocation2 + $0x88] sm:$0xff] }
 0x1a7   : > { %v2937_v30 = vpop.f32.mrf.mxu1  ;;  %v2826_v32 = vadd.f32 %v2825_v29, %v2824_v26 }
 0x1a8   : > { %v1229_v31 = vadd.f32 %v1109_v28, %v619_v25  ;;  %v2938_v33 = vadd.f32 %v2937_v30, %v2936_v27  ;;  %v2827_v35 = vpop.f32.mrf.mxu0 }
 0x1a9   : > { %v2939_v36 = vpop.f32.mrf.mxu1 }
 0x1aa   : > { %1261 = vst [vmem:[#allocation2 + $0xd8] sm:$0xff] %v1229_v31  ;;  %v1112_v37 = vadd.f32 %v2938_v33, %v2826_v32  ;;  %v2828_v38 = vpop.f32.mrf.mxu0  ;;  %v627_v33 = vld [vmem:[#allocation2 + $0xe8] sm:$0xff] }
 0x1ab   : > { %v2940_v39 = vpop.f32.mrf.mxu1  ;;  %v2829_v41 = vadd.f32 %v2828_v38, %v2827_v35 }
 0x1ac   : > { %v1230_v40 = vadd.f32 %v1112_v37, %v620_v34  ;;  %v2941_v42 = vadd.f32 %v2940_v39, %v2939_v36  ;;  %v2830_v44 = vpop.f32.mrf.mxu0 }
 0x1ad   : > { %v2942_v45 = vpop.f32.mrf.mxu1 }
 0x1ae   : > { %1262 = vst [vmem:[#allocation2 + $0x18] sm:$0xff] %v1230_v40  ;;  %v1117_v46 = vadd.f32 %v2941_v42, %v2829_v41  ;;  %v2831_v47 = vpop.f32.mrf.mxu0  ;;  %v628_v42 = vld [vmem:[#allocation2 + $0xb8] sm:$0xff] }
 0x1af   : > { %v2943_v48 = vpop.f32.mrf.mxu1  ;;  %v2832_v50 = vadd.f32 %v2831_v47, %v2830_v44 }
 0x1b0   : > { %v1231_v49 = vadd.f32 %v1117_v46, %v621_v43  ;;  %v2944_v51 = vadd.f32 %v2943_v48, %v2942_v45  ;;  %v2833_v53 = vpop.f32.mrf.mxu0 }
 0x1b1   : > { %v2945_v54 = vpop.f32.mrf.mxu1 }
 0x1b2   : > { %1263 = vst [vmem:[#allocation2 + $0x50] sm:$0xff] %v1231_v49  ;;  %v1120_v55 = vadd.f32 %v2944_v51, %v2832_v50  ;;  %v2834_v56 = vpop.f32.mrf.mxu0  ;;  %v629_v51 = vld [vmem:[#allocation2 + $0x60] sm:$0xff] }
 0x1b3   : > { %v2946_v57 = vpop.f32.mrf.mxu1  ;;  %v2835_v59 = vadd.f32 %v2834_v56, %v2833_v53 }
 0x1b4   : > { %v1232_v58 = vadd.f32 %v1120_v55, %v622_v52  ;;  %v2947_v60 = vadd.f32 %v2946_v57, %v2945_v54  ;;  %v2836_v62 = vpop.f32.mrf.mxu0 }
 0x1b5   : > { %v2948_v63 = vpop.f32.mrf.mxu1 }
 0x1b6   : > { %1264 = vst [vmem:[#allocation2 + $0x68] sm:$0xff] %v1232_v58  ;;  %v1125_v0 = vadd.f32 %v2947_v60, %v2835_v59  ;;  %v2837_v1 = vpop.f32.mrf.mxu0  ;;  %v630_v60 = vld [vmem:[#allocation2 + $0xf0] sm:$0xff] }
 0x1b7   : > { %v2949_v2 = vpop.f32.mrf.mxu1  ;;  %v2838_v4 = vadd.f32 %v2837_v1, %v2836_v62 }
 0x1b8   : > { %v1233_v3 = vadd.f32 %v1125_v0, %v623_v61  ;;  %v2950_v5 = vadd.f32 %v2949_v2, %v2948_v63  ;;  %v2839_v7 = vpop.f32.mrf.mxu0 }
 0x1b9   : > { %v2951_v8 = vpop.f32.mrf.mxu1 }
 0x1ba   : > { %1265 = vst [vmem:[#allocation2 + $0x30] sm:$0xff] %v1233_v3  ;;  %v1128_v9 = vadd.f32 %v2950_v5, %v2838_v4  ;;  %v2840_v10 = vpop.f32.mrf.mxu0  ;;  %v631_v5 = vld [vmem:[#allocation2 + $0x8] sm:$0xff] }
 0x1bb   : > { %v2952_v11 = vpop.f32.mrf.mxu1  ;;  %v2841_v13 = vadd.f32 %v2840_v10, %v2839_v7 }
 0x1bc   : > { %v1234_v12 = vadd.f32 %v1128_v9, %v624_v6  ;;  %v2953_v14 = vadd.f32 %v2952_v11, %v2951_v8  ;;  %v2842_v16 = vpop.f32.mrf.mxu0 }
 0x1bd   : > { %v2954_v17 = vpop.f32.mrf.mxu1 }
 0x1be   : > { %1266 = vst [vmem:[#allocation2 + $0x48] sm:$0xff] %v1234_v12  ;;  %v1133_v18 = vadd.f32 %v2953_v14, %v2841_v13  ;;  %v2843_v19 = vpop.f32.mrf.mxu0  ;;  %v632_v14 = vld [vmem:[#allocation2 + $0x78] sm:$0xff] }
 0x1bf   : > { %v2955_v20 = vpop.f32.mrf.mxu1  ;;  %v2844_v22 = vadd.f32 %v2843_v19, %v2842_v16 }
 0x1c0   : > { %v1235_v21 = vadd.f32 %v1133_v18, %v625_v15  ;;  %v2956_v23 = vadd.f32 %v2955_v20, %v2954_v17  ;;  %v2845_v25 = vpop.f32.mrf.mxu0 }
 0x1c1   : > { %v2957_v26 = vpop.f32.mrf.mxu1 }
 0x1c2   : > { %1267 = vst [vmem:[#allocation2 + $0x80] sm:$0xff] %v1235_v21  ;;  %v1136_v27 = vadd.f32 %v2956_v23, %v2844_v22  ;;  %v2846_v28 = vpop.f32.mrf.mxu0  ;;  %v633_v23 = vld [vmem:[#allocation2 + $0x38] sm:$0xff] }
 0x1c3   : > { %v2958_v29 = vpop.f32.mrf.mxu1  ;;  %v2847_v31 = vadd.f32 %v2846_v28, %v2845_v25 }
 0x1c4   : > { %v1236_v30 = vadd.f32 %v1136_v27, %v626_v24  ;;  %v2959_v32 = vadd.f32 %v2958_v29, %v2957_v26  ;;  %v2848_v34 = vpop.f32.mrf.mxu0 }
 0x1c5   : > { %v2960_v35 = vpop.f32.mrf.mxu1 }
 0x1c6   : > { %1268 = vst [vmem:[#allocation2 + $0x88] sm:$0xff] %v1236_v30  ;;  %v1141_v36 = vadd.f32 %v2959_v32, %v2847_v31  ;;  %v2849_v37 = vpop.f32.mrf.mxu0  ;;  %v634_v32 = vld [vmem:[#allocation2 + $0x58] sm:$0xff] }
 0x1c7   : > { %v2961_v38 = vpop.f32.mrf.mxu1  ;;  %v2850_v40 = vadd.f32 %v2849_v37, %v2848_v34 }
 0x1c8   : > { %v1237_v39 = vadd.f32 %v1141_v36, %v627_v33  ;;  %v2962_v41 = vadd.f32 %v2961_v38, %v2960_v35  ;;  %v2851_v43 = vpop.f32.mrf.mxu0 }
 0x1c9   : > { %v2963_v44 = vpop.f32.mrf.mxu1 }
 0x1ca   : > { %1269 = vst [vmem:[#allocation2 + $0xe8] sm:$0xff] %v1237_v39  ;;  %v1144_v45 = vadd.f32 %v2962_v41, %v2850_v40  ;;  %v2852_v46 = vpop.f32.mrf.mxu0  ;;  %v635_v41 = vld [vmem:[#allocation2 + $0x40] sm:$0xff] }
 0x1cb   : > { %v2964_v47 = vpop.f32.mrf.mxu1  ;;  %v2853_v49 = vadd.f32 %v2852_v46, %v2851_v43 }
 0x1cc   : > { %v1238_v48 = vadd.f32 %v1144_v45, %v628_v42  ;;  %v2965_v50 = vadd.f32 %v2964_v47, %v2963_v44  ;;  %v2854_v52 = vpop.f32.mrf.mxu0 }
 0x1cd   : > { %v2966_v53 = vpop.f32.mrf.mxu1 }
 0x1ce   : > { %1270 = vst [vmem:[#allocation2 + $0xb8] sm:$0xff] %v1238_v48  ;;  %v1149_v54 = vadd.f32 %v2965_v50, %v2853_v49  ;;  %v2855_v55 = vpop.f32.mrf.mxu0  ;;  %v636_v50 = vld [vmem:[#allocation2 + $0xc8] sm:$0xff] }
 0x1cf   : > { %v2967_v56 = vpop.f32.mrf.mxu1  ;;  %v2856_v58 = vadd.f32 %v2855_v55, %v2854_v52 }
 0x1d0   : > { %v1239_v57 = vadd.f32 %v1149_v54, %v629_v51  ;;  %v2968_v59 = vadd.f32 %v2967_v56, %v2966_v53  ;;  %v2857_v61 = vpop.f32.mrf.mxu0 }
 0x1d1   : > { %v2969_v62 = vpop.f32.mrf.mxu1 }
 0x1d2   : > { %1271 = vst [vmem:[#allocation2 + $0x60] sm:$0xff] %v1239_v57  ;;  %v1152_v63 = vadd.f32 %v2968_v59, %v2856_v58  ;;  %v2858_v0 = vpop.f32.mrf.mxu0  ;;  %v637_v59 = vld [vmem:[#allocation2 + $0xe0] sm:$0xff] }
 0x1d3   : > { %v2970_v1 = vpop.f32.mrf.mxu1  ;;  %v2859_v3 = vadd.f32 %v2858_v0, %v2857_v61 }
 0x1d4   : > { %v1240_v2 = vadd.f32 %v1152_v63, %v630_v60  ;;  %v2971_v4 = vadd.f32 %v2970_v1, %v2969_v62  ;;  %v2860_v6 = vpop.f32.mrf.mxu0 }
 0x1d5   : > { %v2972_v7 = vpop.f32.mrf.mxu1 }
 0x1d6   : > { %1272 = vst [vmem:[#allocation2 + $0xf0] sm:$0xff] %v1240_v2  ;;  %v1157_v8 = vadd.f32 %v2971_v4, %v2859_v3  ;;  %v2861_v9 = vpop.f32.mrf.mxu0  ;;  %v638_v4 = vld [vmem:[#allocation2 + $0x90] sm:$0xff] }
 0x1d7   : > { %v2973_v10 = vpop.f32.mrf.mxu1  ;;  %v2862_v12 = vadd.f32 %v2861_v9, %v2860_v6 }
 0x1d8   : > { %v1241_v11 = vadd.f32 %v1157_v8, %v631_v5  ;;  %v2974_v13 = vadd.f32 %v2973_v10, %v2972_v7  ;;  %v2863_v15 = vpop.f32.mrf.mxu0 }
 0x1d9   : > { %v2975_v16 = vpop.f32.mrf.mxu1 }
 0x1da   : > { %1273 = vst [vmem:[#allocation2 + $0x8] sm:$0xff] %v1241_v11  ;;  %v1160_v17 = vadd.f32 %v2974_v13, %v2862_v12  ;;  %v2864_v18 = vpop.f32.mrf.mxu0  ;;  %v639_v13 = vld [vmem:[#allocation2 + $0x70] sm:$0xff] }
 0x1db   : > { %v2976_v19 = vpop.f32.mrf.mxu1  ;;  %v2865_v21 = vadd.f32 %v2864_v18, %v2863_v15 }
 0x1dc   : > { %v1242_v20 = vadd.f32 %v1160_v17, %v632_v14  ;;  %v2977_v22 = vadd.f32 %v2976_v19, %v2975_v16  ;;  %v2866_v24 = vpop.f32.mrf.mxu0 }
 0x1dd   : > { %v2978_v25 = vpop.f32.mrf.mxu1 }
 0x1de   : > { %1274 = vst [vmem:[#allocation2 + $0x78] sm:$0xff] %v1242_v20  ;;  %v1165_v26 = vadd.f32 %v2977_v22, %v2865_v21  ;;  %v2867_v27 = vpop.f32.mrf.mxu0  ;;  %v640_v22 = vld [vmem:[#allocation2 + $0xc0] sm:$0xff] }
 0x1df   : > { %v2979_v28 = vpop.f32.mrf.mxu1  ;;  %v2868_v30 = vadd.f32 %v2867_v27, %v2866_v24 }
 0x1e0   : > { %v1243_v29 = vadd.f32 %v1165_v26, %v633_v23  ;;  %v2980_v31 = vadd.f32 %v2979_v28, %v2978_v25  ;;  %v2869_v33 = vpop.f32.mrf.mxu0 }
 0x1e1   : > { %v2981_v34 = vpop.f32.mrf.mxu1 }
 0x1e2   : > { %1275 = vst [vmem:[#allocation2 + $0x38] sm:$0xff] %v1243_v29  ;;  %v1168_v35 = vadd.f32 %v2980_v31, %v2868_v30  ;;  %v2870_v36 = vpop.f32.mrf.mxu0  ;;  %v641_v31 = vld [vmem:[#allocation2 + $0xa8] sm:$0xff] }
 0x1e3   : > { %v2982_v37 = vpop.f32.mrf.mxu1  ;;  %v2871_v39 = vadd.f32 %v2870_v36, %v2869_v33 }
 0x1e4   : > { %v1244_v38 = vadd.f32 %v1168_v35, %v634_v32  ;;  %v2983_v40 = vadd.f32 %v2982_v37, %v2981_v34  ;;  %v2872_v42 = vpop.f32.mrf.mxu0 }
 0x1e5   : > { %v2984_v43 = vpop.f32.mrf.mxu1 }
 0x1e6   : > { %1276 = vst [vmem:[#allocation2 + $0x58] sm:$0xff] %v1244_v38  ;;  %v1173_v44 = vadd.f32 %v2983_v40, %v2871_v39  ;;  %v2873_v45 = vpop.f32.mrf.mxu0  ;;  %v642_v40 = vld [vmem:[#allocation2 + $0xd0] sm:$0xff] }
 0x1e7   : > { %v2985_v46 = vpop.f32.mrf.mxu1  ;;  %v2874_v48 = vadd.f32 %v2873_v45, %v2872_v42 }
 0x1e8   : > { %v1245_v47 = vadd.f32 %v1173_v44, %v635_v41  ;;  %v2986_v49 = vadd.f32 %v2985_v46, %v2984_v43  ;;  %v2875_v51 = vpop.f32.mrf.mxu0 }
 0x1e9   : > { %v2987_v52 = vpop.f32.mrf.mxu1 }
 0x1ea   : > { %1277 = vst [vmem:[#allocation2 + $0x40] sm:$0xff] %v1245_v47  ;;  %v1176_v53 = vadd.f32 %v2986_v49, %v2874_v48  ;;  %v2876_v54 = vpop.f32.mrf.mxu0  ;;  %v643_v49 = vld [vmem:[#allocation2 + $0x10] sm:$0xff] }
 0x1eb   : > { %v2988_v55 = vpop.f32.mrf.mxu1  ;;  %v2877_v57 = vadd.f32 %v2876_v54, %v2875_v51 }
 0x1ec   : > { %v1246_v56 = vadd.f32 %v1176_v53, %v636_v50  ;;  %v2989_v58 = vadd.f32 %v2988_v55, %v2987_v52  ;;  %v2878_v60 = vpop.f32.mrf.mxu0 }
 0x1ed   : > { %v2990_v61 = vpop.f32.mrf.mxu1 }
 0x1ee   : > { %1278 = vst [vmem:[#allocation2 + $0xc8] sm:$0xff] %v1246_v56  ;;  %v1181_v62 = vadd.f32 %v2989_v58, %v2877_v57  ;;  %v2879_v63 = vpop.f32.mrf.mxu0  ;;  %v644_v58 = vld [vmem:[#allocation2 + $0x28] sm:$0xff] }
 0x1ef   : > { %v2991_v0 = vpop.f32.mrf.mxu1  ;;  %v2880_v2 = vadd.f32 %v2879_v63, %v2878_v60 }
 0x1f0   : > { %v1247_v1 = vadd.f32 %v1181_v62, %v637_v59  ;;  %v2992_v3 = vadd.f32 %v2991_v0, %v2990_v61  ;;  %v2881_v5 = vpop.f32.mrf.mxu0 }
 0x1f1   : > { %v2993_v6 = vpop.f32.mrf.mxu1 }
 0x1f2   : > { %1279 = vst [vmem:[#allocation2 + $0xe0] sm:$0xff] %v1247_v1  ;;  %v1184_v7 = vadd.f32 %v2992_v3, %v2880_v2  ;;  %v2882_v8 = vpop.f32.mrf.mxu0  ;;  %v645_v3 = vld [vmem:[#allocation2 + $0xa0] sm:$0xff] }
 0x1f3   : > { %v2994_v9 = vpop.f32.mrf.mxu1  ;;  %v2883_v11 = vadd.f32 %v2882_v8, %v2881_v5 }
 0x1f4   : > { %v1248_v10 = vadd.f32 %v1184_v7, %v638_v4  ;;  %v2995_v12 = vadd.f32 %v2994_v9, %v2993_v6  ;;  %v2884_v14 = vpop.f32.mrf.mxu0 }
 0x1f5   : > { %v2996_v15 = vpop.f32.mrf.mxu1 }
 0x1f6   : > { %1280 = vst [vmem:[#allocation2 + $0x90] sm:$0xff] %v1248_v10  ;;  %v1189_v16 = vadd.f32 %v2995_v12, %v2883_v11  ;;  %v2885_v17 = vpop.f32.mrf.mxu0  ;;  %v646_v12 = vld [vmem:[#allocation2 + $0xf8] sm:$0xff] }
 0x1f7   : > { %v2997_v18 = vpop.f32.mrf.mxu1  ;;  %v2886_v20 = vadd.f32 %v2885_v17, %v2884_v14 }
 0x1f8   : > { %v1249_v19 = vadd.f32 %v1189_v16, %v639_v13  ;;  %v2998_v21 = vadd.f32 %v2997_v18, %v2996_v15  ;;  %v2887_v23 = vpop.f32.mrf.mxu0 }
 0x1f9   : > { %v2999_v24 = vpop.f32.mrf.mxu1 }
 0x1fa   : > { %1281 = vst [vmem:[#allocation2 + $0x70] sm:$0xff] %v1249_v19  ;;  %v1192_v25 = vadd.f32 %v2998_v21, %v2886_v20  ;;  %v2888_v26 = vpop.f32.mrf.mxu0  ;;  %v647_v21 = vld [vmem:[#allocation2 + $0x20] sm:$0xff] }
 0x1fb   : > { %v3000_v27 = vpop.f32.mrf.mxu1  ;;  %v2889_v29 = vadd.f32 %v2888_v26, %v2887_v23 }
 0x1fc   : > { %v1250_v28 = vadd.f32 %v1192_v25, %v640_v22  ;;  %v3001_v30 = vadd.f32 %v3000_v27, %v2999_v24  ;;  %v2890_v32 = vpop.f32.mrf.mxu0 }
 0x1fd   : > { %v3002_v33 = vpop.f32.mrf.mxu1 }
 0x1fe   : > { %1282 = vst [vmem:[#allocation2 + $0xc0] sm:$0xff] %v1250_v28  ;;  %v1197_v34 = vadd.f32 %v3001_v30, %v2889_v29  ;;  %v2891_v35 = vpop.f32.mrf.mxu0  ;;  %v648_v30 = vld [vmem:[#allocation2 + $0x98] sm:$0xff] }
 0x1ff   : > { %v3003_v36 = vpop.f32.mrf.mxu1  ;;  %v2892_v38 = vadd.f32 %v2891_v35, %v2890_v32 }
 0x200   : > { %v1251_v37 = vadd.f32 %v1197_v34, %v641_v31  ;;  %v3004_v39 = vadd.f32 %v3003_v36, %v3002_v33  ;;  %v2893_v41 = vpop.f32.mrf.mxu0 }
 0x201   : > { %v3005_v42 = vpop.f32.mrf.mxu1 }
 0x202   : > { %1283 = vst [vmem:[#allocation2 + $0xa8] sm:$0xff] %v1251_v37  ;;  %v1200_v43 = vadd.f32 %v3004_v39, %v2892_v38  ;;  %v2894_v44 = vpop.f32.mrf.mxu0 }
 0x203   : > { %v3006_v45 = vpop.f32.mrf.mxu1  ;;  %v2895_v47 = vadd.f32 %v2894_v44, %v2893_v41 }
 0x204   : > { %v1252_v46 = vadd.f32 %v1200_v43, %v642_v40  ;;  %v3007_v48 = vadd.f32 %v3006_v45, %v3005_v42  ;;  %v2896_v50 = vpop.f32.mrf.mxu0 }
 0x205   : > { %v3008_v51 = vpop.f32.mrf.mxu1 }
 0x206   : > { %1284 = vst [vmem:[#allocation2 + $0xd0] sm:$0xff] %v1252_v46  ;;  %v1205_v52 = vadd.f32 %v3007_v48, %v2895_v47  ;;  %v2897_v53 = vpop.f32.mrf.mxu0 }
 0x207   : > { %v3009_v54 = vpop.f32.mrf.mxu1  ;;  %v2898_v56 = vadd.f32 %v2897_v53, %v2896_v50 }
 0x208   : > { %v1253_v55 = vadd.f32 %v1205_v52, %v643_v49  ;;  %v3010_v57 = vadd.f32 %v3009_v54, %v3008_v51  ;;  %v2899_v59 = vpop.f32.mrf.mxu0 }
 0x209   : > { %v3011_v60 = vpop.f32.mrf.mxu1 }
 0x20a   : > { %1285 = vst [vmem:[#allocation2 + $0x10] sm:$0xff] %v1253_v55  ;;  %v1208_v61 = vadd.f32 %v3010_v57, %v2898_v56  ;;  %v2900_v62 = vpop.f32.mrf.mxu0 }
 0x20b   : > { %v3012_v63 = vpop.f32.mrf.mxu1  ;;  %v2901_v1 = vadd.f32 %v2900_v62, %v2899_v59 }
 0x20c   : > { %v1254_v0 = vadd.f32 %v1208_v61, %v644_v58  ;;  %v3013_v2 = vadd.f32 %v3012_v63, %v3011_v60  ;;  %v2902_v4 = vpop.f32.mrf.mxu0 }
 0x20d   : > { %v3014_v5 = vpop.f32.mrf.mxu1 }
 0x20e   : > { %1286 = vst [vmem:[#allocation2 + $0x28] sm:$0xff] %v1254_v0  ;;  %v1213_v6 = vadd.f32 %v3013_v2, %v2901_v1  ;;  %v2903_v7 = vpop.f32.mrf.mxu0 }
 0x20f   : > { %v3015_v8 = vpop.f32.mrf.mxu1  ;;  %v2904_v10 = vadd.f32 %v2903_v7, %v2902_v4 }
 0x210   : > { %v1255_v9 = vadd.f32 %v1213_v6, %v645_v3  ;;  %v3016_v11 = vadd.f32 %v3015_v8, %v3014_v5  ;;  %v2905_v13 = vpop.f32.mrf.mxu0 }
 0x211   : > { %v3017_v14 = vpop.f32.mrf.mxu1 }
 0x212   : > { %1287 = vst [vmem:[#allocation2 + $0xa0] sm:$0xff] %v1255_v9  ;;  %v1216_v15 = vadd.f32 %v3016_v11, %v2904_v10  ;;  %v2906_v16 = vpop.f32.mrf.mxu0 }
 0x213   : > { %v3018_v17 = vpop.f32.mrf.mxu1  ;;  %v2907_v19 = vadd.f32 %v2906_v16, %v2905_v13 }
 0x214   : > { %v1256_v18 = vadd.f32 %v1216_v15, %v646_v12  ;;  %v3019_v20 = vadd.f32 %v3018_v17, %v3017_v14  ;;  %v2908_v22 = vpop.f32.mrf.mxu0 }
 0x215   : > { %v3020_v23 = vpop.f32.mrf.mxu1 }
 0x216   : > { %1288 = vst [vmem:[#allocation2 + $0xf8] sm:$0xff] %v1256_v18  ;;  %v1221_v24 = vadd.f32 %v3019_v20, %v2907_v19  ;;  %v2909_v25 = vpop.f32.mrf.mxu0 }
 0x217   : > { %v3021_v26 = vpop.f32.mrf.mxu1  ;;  %v2910_v28 = vadd.f32 %v2909_v25, %v2908_v22 }
 0x218   : > { %v1257_v27 = vadd.f32 %v1221_v24, %v647_v21  ;;  %v3022_v29 = vadd.f32 %v3021_v26, %v3020_v23 }
 0x21a   : > { %1289 = vst [vmem:[#allocation2 + $0x20] sm:$0xff] %v1257_v27  ;;  %v1224_v31 = vadd.f32 %v3022_v29, %v2910_v28 }
 0x21c   : > { %v1258_v32 = vadd.f32 %v1224_v31, %v648_v30 }
 0x21e   : > { %1290 = vst [vmem:[#allocation2 + $0x98] sm:$0xff] %v1258_v32 }
 0x21f PF: > { %v1328_v33 = vld [vmem:[%s3946_s0 + $0x10] sm:$0xff]  ;;  %v1326_v34 = vld [vmem:[%s3946_s0] sm:$0xff]  ;;  %v3618_v35 = vmov 0   ;;  %v1329_v36 = vld [vmem:[%s3946_s0 + $0x18] sm:$0xff]  ;;  %s2703_s28 = sshll.u32 %s3599_s23, 11  ;;  %s2389_s11 = sshll.u32 %s3954_s29, 4  ;;  %s4153_s11 = int_to_ptr.vmem [resolvable:$true] %s2389_s11 }
 0x220   : > { %3324 = vset.pattern.permute.xlu1 %v3618_v35  ;;  %3323 = vset.pattern.permute.xlu0 %v3618_v35  ;;  %v1327_v37 = vld [vmem:[%s3946_s0 + $0x8] sm:$0xff]  ;;  %v1330_v39 = vld [vmem:[%s3946_s0 + $0x20] sm:$0xff]  ;;  %v1333_v40 = vld [vmem:[%s3946_s0 + $0x38] sm:$0xff]  ;;  %s4279_s16 = sld [smem:[#allocation33_spill]]  ;;  %s4159_s12 = scalar_lea.sflag [#allocation8], %s388_s1 }
 0x221   : > { %1370 = vperm.xlu1 %3324, %v1328_v33   ;;  %1360 = vperm.xlu0 %3323, %v1326_v34   ;;  %v1331_v38 = vld [vmem:[%s3946_s0 + $0x28] sm:$0xff]  ;;  %v1332_v41 = vld [vmem:[%s3946_s0 + $0x30] sm:$0xff]  ;;  %v3325_v42 = vld [vmem:[#allocation11 + $0x38] sm:$0xff]   ;;  %s3489_s23 = scalar_lea.vmem %s4153_s11, 2048  ;;  %p4280_p3 = scmp.ne.s32.totalorder %s4261_s6, 0 }
 0x222   : > { %v3326_v43 = vld [vmem:[#allocation11 + $0x30] sm:$0xff]   ;;  %v1335_v44 = vld [vmem:[%s3946_s0 + $0x48] sm:$0xff]  ;;  %3119 = vmatprep.subr.bf16.mxu1 %v3325_v42  ;;  %v3327_v45 = vld [vmem:[#allocation12 + $0x38] sm:$0xff]   ;;  %p3490_p8 = scmp.ne.s32.totalorder %s4153_s11, %s3489_s23  ;;  %s3619_s30 = smov [#allocation14]  }
 0x223   : > { %v1334_v46 = vld [vmem:[%s3946_s0 + $0x40] sm:$0xff]  ;;  %3120 = vmatpush3.bf16.msra.mxu1 %v3325_v42  ;;  %3071 = vmatprep.subr.bf16.mxu0 %v3327_v45  ;;  %v3329_v47 = vld [vmem:[#allocation12 + $0x30] sm:$0xff]   ;;  %v3328_v48 = vld [vmem:[#allocation11 + $0x28] sm:$0xff]   ;;  %s3493_s8 = sshll.u32 %s3619_s30, 4  ;;  %s3494_s8 = int_to_ptr.vmem [resolvable:$false] %s3493_s8 }
 0x224   : > { %3121 = vmatprep.subr.bf16.mxu1 %v3326_v43  ;;  %3072 = vmatpush3.bf16.msra.mxu0 %v3327_v45  ;;  %v3331_v49 = vld [vmem:[#allocation12 + $0x28] sm:$0xff]   ;;  %v1337_v50 = vld [vmem:[%s3946_s0 + $0x58] sm:$0xff]  ;;  %v1336_v51 = vld [vmem:[%s3946_s0 + $0x50] sm:$0xff]  ;;  %p3491_p7 = pnand %p3490_p8, %p4280_p3  ;;  %p3496_p1 = scmp.lt.s32.totalorder %s4153_s11, %s3494_s8 }
 0x225   : > { %1375 = vperm.xlu1 %3324, %v1329_v36   ;;  %1365 = vperm.xlu0 %3323, %v1327_v37   ;;  %v3330_v52 = vld [vmem:[#allocation11 + $0x20] sm:$0xff]   ;;  %v1339_v54 = vld [vmem:[%s3946_s0 + $0x68] sm:$0xff]  ;;  %v3332_v56 = vld [vmem:[#allocation11 + $0x18] sm:$0xff]  }
 0x226   : > { %3073 = vmatprep.subr.bf16.mxu0 %v3329_v47  ;;  %v3333_v53 = vld [vmem:[#allocation12 + $0x20] sm:$0xff]   ;;  %v1341_v57 = vld [vmem:[%s3946_s0 + $0x78] sm:$0xff]  ;;  %v1340_v59 = vld [vmem:[%s3946_s0 + $0x70] sm:$0xff]  ;;  %s4151_s15 = scalar_lea.hbm %s4279_s16, %s2703_s28  ;;  %p3492_p12 = pneg %p3491_p7 }
 0x227   : > { %3122 = vmatpush3.bf16.msra.mxu1 %v3326_v43  ;;  %v1338_v55 = vld [vmem:[%s3946_s0 + $0x60] sm:$0xff]  ;;  %v3335_v58 = vld [vmem:[#allocation12 + $0x18] sm:$0xff]   ;;  %v3334_v61 = vld [vmem:[#allocation11 + $0x10] sm:$0xff]  }
 0x228   : > { %3123 = vmatprep.subr.bf16.mxu1 %v3328_v48  ;;  %3074 = vmatpush3.bf16.msra.mxu0 %v3329_v47  ;;  %v3340_v60 = vld [vmem:[%s3912_s9] sm:$0xff]   ;;  %v3337_v62 = vld [vmem:[#allocation12 + $0x10] sm:$0xff]   ;;  %v1343_v63 = vld [vmem:[%s3946_s0 + $0x88] sm:$0xff] }
 0x229   : > { %1385 = vperm.xlu1 %3324, %v1331_v38   ;;  %1380 = vperm.xlu0 %3323, %v1330_v39   ;;  %v1342_v0 = vld [vmem:[%s3946_s0 + $0x80] sm:$0xff]  ;;  %v3336_v1 = vld [vmem:[#allocation11 + $0x8] sm:$0xff]   ;;  %v1345_v3 = vld [vmem:[%s3946_s0 + $0x98] sm:$0xff] }
 0x22a   : > { %3075 = vmatprep.subr.bf16.mxu0 %v3331_v49  ;;  %3135 = vmatprep.mubr.bf16.mxu1 %v3340_v60  ;;  %v3339_v2 = vld [vmem:[#allocation12 + $0x8] sm:$0xff]   ;;  %v1344_v4 = vld [vmem:[%s3946_s0 + $0x90] sm:$0xff]  ;;  %v3338_v5 = vld [vmem:[#allocation11] sm:$0xff]  }
 0x22b   : > { %3124 = vmatpush3.bf16.msra.mxu1 %v3328_v48  ;;  %v3342_v6 = vld [vmem:[#allocation12] sm:$0xff]   ;;  %v1347_v7 = vld [vmem:[%s3946_s0 + $0xa8] sm:$0xff]  ;;  %v1349_v9 = vld [vmem:[%s3946_s0 + $0xb8] sm:$0xff] }
 0x22c   : > { %3125 = vmatprep.subr.bf16.mxu1 %v3330_v52  ;;  %3076 = vmatpush3.bf16.msra.mxu0 %v3331_v49  ;;  %v1346_v8 = vld [vmem:[%s3946_s0 + $0xa0] sm:$0xff]  ;;  %v1348_v10 = vld [vmem:[%s3946_s0 + $0xb0] sm:$0xff]  ;;  %v3341_v11 = vld [vmem:[%s3912_s9 + $0x8] sm:$0xff]  }
 0x22d   : > { %1395 = vperm.xlu1 %3324, %v1333_v40   ;;  %1390 = vperm.xlu0 %3323, %v1332_v41   ;;  %v3343_v12 = vld [vmem:[%s3912_s9 + $0x10] sm:$0xff]   ;;  %v1351_v13 = vld [vmem:[%s3946_s0 + $0xc8] sm:$0xff]  ;;  %v1350_v14 = vld [vmem:[%s3946_s0 + $0xc0] sm:$0xff] }
 0x22e   : > { %3077 = vmatprep.subr.bf16.mxu0 %v3333_v53  ;;  %v1353_v15 = vld [vmem:[%s3946_s0 + $0xd8] sm:$0xff]  ;;  %v1352_v16 = vld [vmem:[%s3946_s0 + $0xd0] sm:$0xff]  ;;  %v3345_v18 = vld [vmem:[%s3912_s9 + $0x20] sm:$0xff]  }
 0x22f   : > { %3126 = vmatpush3.bf16.msra.mxu1 %v3330_v52  ;;  %v3344_v17 = vld [vmem:[%s3912_s9 + $0x18] sm:$0xff]   ;;  %v1355_v19 = vld [vmem:[%s3946_s0 + $0xe8] sm:$0xff]  ;;  %v1354_v20 = vld [vmem:[%s3946_s0 + $0xe0] sm:$0xff] }
 0x230   : > { %3127 = vmatprep.subr.bf16.mxu1 %v3332_v56  ;;  %3078 = vmatpush3.bf16.msra.mxu0 %v3333_v53  ;;  %v1357_v21 = vld [vmem:[%s3946_s0 + $0xf8] sm:$0xff]  ;;  %v1356_v22 = vld [vmem:[%s3946_s0 + $0xf0] sm:$0xff]  ;;  %v3346_v23 = vld [vmem:[%s3912_s9 + $0x28] sm:$0xff]   ;;  %s3495_s0 = scalar_lea.vmem %s3494_s8, 4096 }
 0x231   : > { %1405 = vperm.xlu1 %3324, %v1335_v44   ;;  %1400 = vperm.xlu0 %3323, %v1334_v46   ;;  %v3347_v24 = vld [vmem:[%s3912_s9 + $0x30] sm:$0xff]   ;;  %v3348_v25 = vld [vmem:[%s3912_s9 + $0x38] sm:$0xff]   ;;  %v3349_v26 = vld [vmem:[%s3912_s9 + $0x40] sm:$0xff]   ;;  %p3497_p5 = scmp.lt.s32.totalorder %s3495_s0, %s3489_s23 }
 0x232   : > { %3079 = vmatprep.subr.bf16.mxu0 %v3335_v58  ;;  %v3350_v27 = vld [vmem:[%s3912_s9 + $0x48] sm:$0xff]   ;;  %v3351_v28 = vld [vmem:[%s3912_s9 + $0x50] sm:$0xff]   ;;  %v3352_v29 = vld [vmem:[%s3912_s9 + $0x58] sm:$0xff]  }
 0x233   : > { %3128 = vmatpush3.bf16.msra.mxu1 %v3332_v56  ;;  %v3353_v30 = vld [vmem:[%s3912_s9 + $0x60] sm:$0xff]   ;;  %v3354_v31 = vld [vmem:[%s3912_s9 + $0x68] sm:$0xff]   ;;  %v3355_v32 = vld [vmem:[%s3912_s9 + $0x70] sm:$0xff]   ;;  %p3498_p11 = por %p3497_p5, %p3496_p1 }
 0x234   : > { %3129 = vmatprep.subr.bf16.mxu1 %v3334_v61  ;;  %3080 = vmatpush3.bf16.msra.mxu0 %v3335_v58  ;;  %v3356_v33 = vld [vmem:[%s3912_s9 + $0x78] sm:$0xff]   ;;  %v1294_v37 = vld [vmem:[#allocation2 + $0xb0] sm:$0xff]  ;;  %v1295_v39 = vld [vmem:[#allocation2] sm:$0xff]  ;;  %s4278_s9 = sld [smem:[#allocation32_spill]] }
 0x235   : > { %1415 = vperm.xlu1 %3324, %v1337_v50   ;;  %1410 = vperm.xlu0 %3323, %v1336_v51   ;;  %v1296_v36 = vld [vmem:[#allocation2 + $0xd8] sm:$0xff]  ;;  %v1299_v46 = vld [vmem:[#allocation2 + $0x68] sm:$0xff]  ;;  %v1298_v47 = vld [vmem:[#allocation2 + $0x50] sm:$0xff]  ;;  %p3499_p0 = pnand %p3498_p11, %p3492_p12 }
 0x236   : > { %3081 = vmatprep.subr.bf16.mxu0 %v3337_v62  ;;  %v1297_v38 = vld [vmem:[#allocation2 + $0x18] sm:$0xff] }
 0x237   : > { %3130 = vmatpush3.bf16.msra.mxu1 %v3334_v61  ;;  %v1303_v61 = vld [vmem:[#allocation2 + $0x88] sm:$0xff] }
 0x238   : > { %3131 = vmatprep.subr.bf16.mxu1 %v3336_v1  ;;  %3082 = vmatpush3.bf16.msra.mxu0 %v3337_v62  ;;  %v1302_v62 = vld [vmem:[#allocation2 + $0x80] sm:$0xff] }
 0x239   : > { %1425 = vperm.xlu1 %3324, %v1339_v54   ;;  %1420 = vperm.xlu0 %3323, %v1338_v55   ;;  %v1301_v54 = vld [vmem:[#allocation2 + $0x48] sm:$0xff]  ;;  %v1300_v55 = vld [vmem:[#allocation2 + $0x30] sm:$0xff] }
 0x23a   : > { %3083 = vmatprep.subr.bf16.mxu0 %v3339_v2 }
 0x23b   : > { %3132 = vmatpush3.bf16.msra.mxu1 %v3336_v1 }
 0x23c   : > { %3133 = vmatprep.subr.bf16.mxu1 %v3338_v5  ;;  %3084 = vmatpush3.bf16.msra.mxu0 %v3339_v2 }
 0x23d   : > { %1435 = vperm.xlu1 %3324, %v1341_v57   ;;  %1430 = vperm.xlu0 %3323, %v1340_v59  }
 0x23e   : > { %3085 = vmatprep.subr.bf16.mxu0 %v3342_v6 }
 0x23f   : > { %3134 = vmatpush3.bf16.msra.mxu1 %v3338_v5  ;;  %v1304_v5 = vld [vmem:[#allocation2 + $0xe8] sm:$0xff] }
 0x240   : > { %3086 = vmatpush3.bf16.msra.mxu0 %v3342_v6 }
 0x241   : > { %1445 = vperm.xlu1 %3324, %v1343_v63   ;;  %1440 = vperm.xlu0 %3323, %v1342_v0  }
 0x242   : > { %3136 = vmatmul.mubr.bf16.vlgmr.msra.gmra.mxu1 %v3341_v11  ;;  %v1307_v11 = vld [vmem:[#allocation2 + $0xf0] sm:$0xff] }
 0x243   : > { %3139 = vmatprep.mubr.bf16.mxu1 %v3343_v12  ;;  %v1306_v12 = vld [vmem:[#allocation2 + $0x60] sm:$0xff] }
 0x245   : > { %1455 = vperm.xlu1 %3324, %v1345_v3   ;;  %1450 = vperm.xlu0 %3323, %v1344_v4   ;;  %v1305_v4 = vld [vmem:[#allocation2 + $0xb8] sm:$0xff] }
 0x249   : > { %1465 = vperm.xlu1 %3324, %v1347_v7   ;;  %1460 = vperm.xlu0 %3323, %v1346_v8  }
 0x24a   : > { %3140 = vmatmul.mubr.bf16.gmra.mxu1 %v3344_v17 }
 0x24b   : > { %3143 = vmatprep.mubr.bf16.mxu1 %v3345_v18  ;;  %v1309_v18 = vld [vmem:[#allocation2 + $0x78] sm:$0xff] }
 0x24d   : > { %1475 = vperm.xlu1 %3324, %v1349_v9   ;;  %1470 = vperm.xlu0 %3323, %v1348_v10  }
 0x251   : > { %1485 = vperm.xlu1 %3324, %v1351_v13   ;;  %1480 = vperm.xlu0 %3323, %v1350_v14  }
 0x252   : > { %3144 = vmatmul.mubr.bf16.gmra.mxu1 %v3346_v23 }
 0x253   : > { %3147 = vmatprep.mubr.bf16.mxu1 %v3347_v24 }
 0x255   : > { %1495 = vperm.xlu1 %3324, %v1353_v15   ;;  %1490 = vperm.xlu0 %3323, %v1352_v16  }
 0x259   : > { %1505 = vperm.xlu1 %3324, %v1355_v19   ;;  %1500 = vperm.xlu0 %3323, %v1354_v20   ;;  %v1308_v19 = vld [vmem:[#allocation2 + $0x8] sm:$0xff] }
 0x25a   : > { %3148 = vmatmul.mubr.bf16.gmra.mxu1 %v3348_v25  ;;  %v1311_v25 = vld [vmem:[#allocation2 + $0x58] sm:$0xff] }
 0x25b   : > { %3151 = vmatprep.mubr.bf16.mxu1 %v3349_v26  ;;  %v1310_v26 = vld [vmem:[#allocation2 + $0x38] sm:$0xff] }
 0x25d   : > { %1515 = vperm.xlu1 %3324, %v1357_v21   ;;  %1510 = vperm.xlu0 %3323, %v1356_v22  }
 0x262   : > { %3152 = vmatmul.mubr.bf16.gmra.mxu1 %v3350_v27 }
 0x263   : > { %3155 = vmatprep.mubr.bf16.mxu1 %v3351_v28 }
 0x26a   : > { %3156 = vmatmul.mubr.bf16.gmra.mxu1 %v3352_v29 }
 0x26b   : > { %3159 = vmatprep.mubr.bf16.mxu1 %v3353_v30 }
 0x272   : > { %3160 = vmatmul.mubr.bf16.gmra.mxu1 %v3354_v31 }
 0x273   : > { %3163 = vmatprep.mubr.bf16.mxu1 %v3355_v32  ;;  %v1313_v32 = vld [vmem:[#allocation2 + $0xc8] sm:$0xff] }
 0x27a   : > { %3164 = vmatmul.mubr.bf16.gmra.mxu1 %v3356_v33  ;;  %v1312_v33 = vld [vmem:[#allocation2 + $0x40] sm:$0xff] }
 0x29c   : > { %v1371_v34 = vpop.permute.xlu1 %1370  ;;  %v1361_v35 = vpop.permute.xlu0 %1360 }
 0x29d   : > { %v1520_v42 = vmul.f32 %v1371_v34, %v1296_v36  ;;  %v1518_v43 = vmul.f32 %v1361_v35, %v1294_v37 }
 0x2a0   : > { %v1376_v40 = vpop.permute.xlu1 %1375  ;;  %v1366_v41 = vpop.permute.xlu0 %1365 }
 0x2a1   : > { %v1521_v44 = vmul.f32 %v1376_v40, %v1297_v38  ;;  %v1519_v45 = vmul.f32 %v1366_v41, %v1295_v39  ;;  %v1315_v39 = vld [vmem:[#allocation2 + $0x90] sm:$0xff]  ;;  %v1314_v40 = vld [vmem:[#allocation2 + $0xe0] sm:$0xff] }
 0x2a3   : > { %v1551_v48 = vpack.c.bf16 %v1521_v44, %v1520_v42  ;;  %v1550_v49 = vpack.c.bf16 %v1519_v45, %v1518_v43 }
 0x2a4   : > { %v1386_v50 = vpop.permute.xlu1 %1385  ;;  %v1381_v51 = vpop.permute.xlu0 %1380 }
 0x2a5   : > { %v1523_v52 = vmul.f32 %v1386_v50, %v1299_v46  ;;  %v1522_v53 = vmul.f32 %v1381_v51, %v1298_v47  ;;  %3087 = vmatprep.mubr.bf16.mxu0 %v1550_v49  ;;  %v1317_v46 = vld [vmem:[#allocation2 + $0xc0] sm:$0xff]  ;;  %v1316_v47 = vld [vmem:[#allocation2 + $0x70] sm:$0xff] }
 0x2a6   : > { %3088 = vmatmul.mubr.bf16.vlgmr.msra.gmra.mxu0 %v1551_v48 }
 0x2a7   : > { %v1552_v56 = vpack.c.bf16 %v1523_v52, %v1522_v53  ;;  %v1319_v53 = vld [vmem:[#allocation2 + $0xd0] sm:$0xff] }
 0x2a8   : > { %v1396_v57 = vpop.permute.xlu1 %1395  ;;  %v1391_v58 = vpop.permute.xlu0 %1390 }
 0x2a9   : > { %v1525_v59 = vmul.f32 %v1396_v57, %v1301_v54  ;;  %v1524_v60 = vmul.f32 %v1391_v58, %v1300_v55  ;;  %3091 = vmatprep.mubr.bf16.mxu0 %v1552_v56  ;;  %v1318_v54 = vld [vmem:[#allocation2 + $0xa8] sm:$0xff] }
 0x2ab   : > { %v1553_v63 = vpack.c.bf16 %v1525_v59, %v1524_v60  ;;  %v1321_v60 = vld [vmem:[#allocation2 + $0x28] sm:$0xff] }
 0x2ac   : > { %v1406_v0 = vpop.permute.xlu1 %1405  ;;  %v1401_v1 = vpop.permute.xlu0 %1400 }
 0x2ad   : > { %v1527_v2 = vmul.f32 %v1406_v0, %v1303_v61  ;;  %v1526_v3 = vmul.f32 %v1401_v1, %v1302_v62  ;;  %v1320_v61 = vld [vmem:[#allocation2 + $0x10] sm:$0xff] }
 0x2ae   : > { %3092 = vmatmul.mubr.bf16.gmra.mxu0 %v1553_v63 }
 0x2af   : > { %v1554_v6 = vpack.c.bf16 %v1527_v2, %v1526_v3  ;;  %v1323_v3 = vld [vmem:[#allocation2 + $0xf8] sm:$0xff] }
 0x2b0   : > { %v1416_v7 = vpop.permute.xlu1 %1415  ;;  %v1411_v8 = vpop.permute.xlu0 %1410 }
 0x2b1   : > { %v1529_v9 = vmul.f32 %v1416_v7, %v1305_v4  ;;  %v1528_v10 = vmul.f32 %v1411_v8, %v1304_v5  ;;  %3095 = vmatprep.mubr.bf16.mxu0 %v1554_v6  ;;  %v1322_v4 = vld [vmem:[#allocation2 + $0xa0] sm:$0xff] }
 0x2b3   : > { %v1555_v13 = vpack.c.bf16 %v1529_v9, %v1528_v10  ;;  %v1325_v10 = vld [vmem:[#allocation2 + $0x98] sm:$0xff] }
 0x2b4   : > { %v1426_v14 = vpop.permute.xlu1 %1425  ;;  %v1421_v15 = vpop.permute.xlu0 %1420 }
 0x2b5   : > { %v1531_v16 = vmul.f32 %v1426_v14, %v1307_v11  ;;  %v1530_v17 = vmul.f32 %v1421_v15, %v1306_v12  ;;  %v1324_v11 = vld [vmem:[#allocation2 + $0x20] sm:$0xff] }
 0x2b6   : > { %3096 = vmatmul.mubr.bf16.gmra.mxu0 %v1555_v13 }
 0x2b7   : > { %v1556_v20 = vpack.c.bf16 %v1531_v16, %v1530_v17 }
 0x2b8   : > { %v1436_v21 = vpop.permute.xlu1 %1435  ;;  %v1431_v22 = vpop.permute.xlu0 %1430 }
 0x2b9   : > { %v1533_v23 = vmul.f32 %v1436_v21, %v1309_v18  ;;  %v1532_v24 = vmul.f32 %v1431_v22, %v1308_v19  ;;  %3099 = vmatprep.mubr.bf16.mxu0 %v1556_v20 }
 0x2bb   : > { %v1557_v27 = vpack.c.bf16 %v1533_v23, %v1532_v24 }
 0x2bc   : > { %v1446_v28 = vpop.permute.xlu1 %1445  ;;  %v1441_v29 = vpop.permute.xlu0 %1440 }
 0x2bd   : > { %v1535_v30 = vmul.f32 %v1446_v28, %v1311_v25  ;;  %v1534_v31 = vmul.f32 %v1441_v29, %v1310_v26 }
 0x2be   : > { %3100 = vmatmul.mubr.bf16.gmra.mxu0 %v1557_v27 }
 0x2bf   : > { %v1558_v34 = vpack.c.bf16 %v1535_v30, %v1534_v31 }
 0x2c0   : > { %v1456_v35 = vpop.permute.xlu1 %1455  ;;  %v1451_v36 = vpop.permute.xlu0 %1450 }
 0x2c1   : > { %v1537_v37 = vmul.f32 %v1456_v35, %v1313_v32  ;;  %v1536_v38 = vmul.f32 %v1451_v36, %v1312_v33  ;;  %3103 = vmatprep.mubr.bf16.mxu0 %v1558_v34  ;;  %v4079_v36 = vld [vmem:[%s4278_s9] ss:$0 sm:$0xff] }
 0x2c3   : > { %v1559_v41 = vpack.c.bf16 %v1537_v37, %v1536_v38 }
 0x2c4   : > { %v1466_v42 = vpop.permute.xlu1 %1465  ;;  %v1461_v43 = vpop.permute.xlu0 %1460 }
 0x2c5   : > { %v1539_v44 = vmul.f32 %v1466_v42, %v1315_v39  ;;  %v1538_v45 = vmul.f32 %v1461_v43, %v1314_v40 }
 0x2c6   : > { %3104 = vmatmul.mubr.bf16.gmra.mxu0 %v1559_v41 }
 0x2c7   : > { %v1560_v48 = vpack.c.bf16 %v1539_v44, %v1538_v45 }
 0x2c8   : > { %v1476_v49 = vpop.permute.xlu1 %1475  ;;  %v1471_v50 = vpop.permute.xlu0 %1470 }
 0x2c9   : > { %v1541_v51 = vmul.f32 %v1476_v49, %v1317_v46  ;;  %v1540_v52 = vmul.f32 %v1471_v50, %v1316_v47  ;;  %3107 = vmatprep.mubr.bf16.mxu0 %v1560_v48 }
 0x2cb   : > { %v1561_v55 = vpack.c.bf16 %v1541_v51, %v1540_v52 }
 0x2cc   : > { %v1486_v56 = vpop.permute.xlu1 %1485  ;;  %v1481_v57 = vpop.permute.xlu0 %1480 }
 0x2cd   : > { %v1543_v58 = vmul.f32 %v1486_v56, %v1319_v53  ;;  %v1542_v59 = vmul.f32 %v1481_v57, %v1318_v54 }
 0x2ce   : > { %3108 = vmatmul.mubr.bf16.gmra.mxu0 %v1561_v55 }
 0x2cf   : > { %v1562_v62 = vpack.c.bf16 %v1543_v58, %v1542_v59 }
 0x2d0   : > { %v1496_v63 = vpop.permute.xlu1 %1495  ;;  %v1491_v0 = vpop.permute.xlu0 %1490 }
 0x2d1   : > { %v1545_v1 = vmul.f32 %v1496_v63, %v1321_v60  ;;  %v1544_v2 = vmul.f32 %v1491_v0, %v1320_v61  ;;  %3111 = vmatprep.mubr.bf16.mxu0 %v1562_v62 }
 0x2d3   : > { %v1563_v5 = vpack.c.bf16 %v1545_v1, %v1544_v2 }
 0x2d4   : > { %v1506_v6 = vpop.permute.xlu1 %1505  ;;  %v1501_v7 = vpop.permute.xlu0 %1500 }
 0x2d5   : > { %v1547_v8 = vmul.f32 %v1506_v6, %v1323_v3  ;;  %v1546_v9 = vmul.f32 %v1501_v7, %v1322_v4 }
 0x2d6   : > { %3112 = vmatmul.mubr.bf16.gmra.mxu0 %v1563_v5 }
 0x2d7   : > { %v1564_v12 = vpack.c.bf16 %v1547_v8, %v1546_v9 }
 0x2d8   : > { %v1516_v13 = vpop.permute.xlu1 %1515  ;;  %v1511_v14 = vpop.permute.xlu0 %1510 }
 0x2d9   : > { %v1549_v15 = vmul.f32 %v1516_v13, %v1325_v10  ;;  %v1548_v16 = vmul.f32 %v1511_v14, %v1324_v11  ;;  %3115 = vmatprep.mubr.bf16.mxu0 %v1564_v12 }
 0x2db   : > { %v1565_v17 = vpack.c.bf16 %v1549_v15, %v1548_v16 }
 0x2de   : > { %3116 = vmatmul.mubr.bf16.gmra.mxu0 %v1565_v17 }
 0x302   : > { %v3137_v18 = vpop.f32.mrf.mxu1 }
 0x304   : > { %v2017_v19 = vpop.f32.mrf.mxu1 }
 0x306   : > { %v3138_v20 = vpop.f32.mrf.mxu1 }
 0x308   : > { %v2020_v21 = vpop.f32.mrf.mxu1 }
 0x30a   : > { %v3141_v22 = vpop.f32.mrf.mxu1 }
 0x30c   : > { %v2033_v23 = vpop.f32.mrf.mxu1 }
 0x30e   : > { %v3142_v24 = vpop.f32.mrf.mxu1 }
 0x310   : > { %v2036_v25 = vpop.f32.mrf.mxu1 }
 0x312   : > { %v3145_v26 = vpop.f32.mrf.mxu1 }
 0x314   : > { %v2049_v27 = vpop.f32.mrf.mxu1 }
 0x316   : > { %v3146_v28 = vpop.f32.mrf.mxu1 }
 0x318   : > { %v2052_v29 = vpop.f32.mrf.mxu1 }
 0x31a   : > { %v4068_v30 = vpop.f32.mrf.mxu1 }
 0x31c   : > { %v4070_v31 = vpop.f32.mrf.mxu1 }
 0x31e   : > { %v4072_v32 = vpop.f32.mrf.mxu1 }
 0x320   : > { %v4074_v33 = vpop.f32.mrf.mxu1 }
 0x322   : > { %v4081_v38 = vpop.f32.mrf.mxu1 }
 0x324   : > { %v4084_v44 = vpop.f32.mrf.mxu1 }
 0x326   : > { %v4089_v54 = vpop.f32.mrf.mxu1 }
 0x328   : > { %v4093_v0 = vpop.f32.mrf.mxu1 }
 0x32a   : > { %v4099_v10 = vpop.f32.mrf.mxu1 }
 0x366   : > { %v3089_v34 = vpop.f32.mrf.mxu0 }
 0x367   : > { %v2026_v35 = vadd.f32 %v3137_v18, %v3089_v34 }
 0x368   : > { %v1712_v37 = vpop.f32.mrf.mxu0 }
 0x369   : > { %v2018_v39 = vadd.f32 %v2017_v19, %v1712_v37  ;;  %v2153_v41 = vadd.f32 %v4079_v36, %v2026_v35 }
 0x36a   : > { %v3090_v40 = vpop.f32.mrf.mxu0 }
 0x36b   : > { %v2029_v42 = vadd.f32 %v3138_v20, %v3090_v40  ;;  %v2151_v45 = vadd.f32 %v4079_v36, %v2018_v39  ;;  %v2185_v49 = vmax.f32 %v2153_v41, 0.0  ;;  %v2097_v20 = vpop.f32.mrf.mxu1 }
 0x36c   : > { %v1715_v43 = vpop.f32.mrf.mxu0 }
 0x36d   : > { %v2154_v46 = vadd.f32 %v4079_v36, %v2029_v42  ;;  %v2021_v47 = vadd.f32 %v2020_v21, %v1715_v43  ;;  %v2183_v55 = vmax.f32 %v2151_v45, 0.0  ;;  %v3158_v37 = vpop.f32.mrf.mxu1 }
 0x36e   : > { %v3093_v48 = vpop.f32.mrf.mxu0 }
 0x36f   : > { %v2186_v50 = vmax.f32 %v2154_v46, 0.0  ;;  %v2152_v51 = vadd.f32 %v4079_v36, %v2021_v47  ;;  %v2042_v52 = vadd.f32 %v3141_v22, %v3093_v48  ;;  %v2100_v47 = vpop.f32.mrf.mxu1 }
 0x370   : > { %v1728_v53 = vpop.f32.mrf.mxu0 }
 0x371   : > { %v2712_v56 = vpack.c.bf16 %v2186_v50, %v2185_v49  ;;  %v2184_v57 = vmax.f32 %v2152_v51, 0.0  ;;  %v2034_v58 = vadd.f32 %v2033_v23, %v1728_v53  ;;  %v2157_v61 = vadd.f32 %v4079_v36, %v2042_v52 }
 0x372   : > { %v3094_v59 = vpop.f32.mrf.mxu0 }
 0x373   : > { %2784 = vst [vmem:[%s3954_s29 + $0x8] sm:$0xff] %v2712_v56   ;;  %v2707_v60 = vpack.c.bf16 %v2184_v57, %v2183_v55  ;;  %v2045_v62 = vadd.f32 %v3142_v24, %v3094_v59  ;;  %v2155_v1 = vadd.f32 %v4079_v36, %v2034_v58  ;;  %v2189_v5 = vmax.f32 %v2157_v61, 0.0 }
 0x374   : > { %v1731_v63 = vpop.f32.mrf.mxu0 }
 0x375   : > { %2708 = vst [vmem:[%s3954_s29] sm:$0xff] %v2707_v60   ;;  %v2158_v2 = vadd.f32 %v4079_v36, %v2045_v62  ;;  %v2037_v3 = vadd.f32 %v2036_v25, %v1731_v63  ;;  %v2187_v11 = vmax.f32 %v2155_v1, 0.0 }
 0x376   : > { %v3097_v4 = vpop.f32.mrf.mxu0 }
 0x377   : > { %v2190_v6 = vmax.f32 %v2158_v2, 0.0  ;;  %v2156_v7 = vadd.f32 %v4079_v36, %v2037_v3  ;;  %v2058_v8 = vadd.f32 %v3145_v26, %v3097_v4 }
 0x378   : > { %v1744_v9 = vpop.f32.mrf.mxu0 }
 0x379   : > { %v2722_v12 = vpack.c.bf16 %v2190_v6, %v2189_v5  ;;  %v2188_v13 = vmax.f32 %v2156_v7, 0.0  ;;  %v2050_v14 = vadd.f32 %v2049_v27, %v1744_v9  ;;  %v2161_v17 = vadd.f32 %v4079_v36, %v2058_v8 }
 0x37a   : > { %v3098_v15 = vpop.f32.mrf.mxu0 }
 0x37b   : > { %2786 = vst [vmem:[%s3954_s29 + $0x18] sm:$0xff] %v2722_v12   ;;  %v2717_v16 = vpack.c.bf16 %v2188_v13, %v2187_v11  ;;  %v2061_v18 = vadd.f32 %v3146_v28, %v3098_v15  ;;  %v2159_v21 = vadd.f32 %v4079_v36, %v2050_v14  ;;  %v2193_v25 = vmax.f32 %v2161_v17, 0.0 }
 0x37c   : > { %v1747_v19 = vpop.f32.mrf.mxu0 }
 0x37d   : > { %2785 = vst [vmem:[%s3954_s29 + $0x10] sm:$0xff] %v2717_v16   ;;  %v2162_v22 = vadd.f32 %v4079_v36, %v2061_v18  ;;  %v2053_v23 = vadd.f32 %v2052_v29, %v1747_v19  ;;  %v2191_v28 = vmax.f32 %v2159_v21, 0.0 }
 0x37e   : > { %v3101_v24 = vpop.f32.mrf.mxu0 }
 0x37f   : > { %v2194_v26 = vmax.f32 %v2162_v22, 0.0  ;;  %v2160_v27 = vadd.f32 %v4079_v36, %v2053_v23  ;;  %v2074_v34 = vadd.f32 %v4068_v30, %v3101_v24 }
 0x380   : > { %v1760_v35 = vpop.f32.mrf.mxu0 }
 0x381   : > { %v2732_v39 = vpack.c.bf16 %v2194_v26, %v2193_v25  ;;  %v2192_v40 = vmax.f32 %v2160_v27, 0.0  ;;  %v2066_v41 = vadd.f32 %v4070_v31, %v1760_v35  ;;  %v2165_v29 = vadd.f32 %v4079_v36, %v2074_v34 }
 0x382   : > { %v3102_v42 = vpop.f32.mrf.mxu0 }
 0x383   : > { %2788 = vst [vmem:[%s3954_s29 + $0x28] sm:$0xff] %v2732_v39   ;;  %v2727_v43 = vpack.c.bf16 %v2192_v40, %v2191_v28  ;;  %v2077_v45 = vadd.f32 %v4072_v32, %v3102_v42  ;;  %v2163_v30 = vadd.f32 %v4079_v36, %v2066_v41  ;;  %v2197_v51 = vmax.f32 %v2165_v29, 0.0  ;;  %v3161_v32 = vpop.f32.mrf.mxu1 }
 0x384   : > { %v1763_v46 = vpop.f32.mrf.mxu0 }
 0x385   : > { %2787 = vst [vmem:[%s3954_s29 + $0x20] sm:$0xff] %v2727_v43   ;;  %v2166_v48 = vadd.f32 %v4079_v36, %v2077_v45  ;;  %v2069_v49 = vadd.f32 %v4074_v33, %v1763_v46  ;;  %v2195_v56 = vmax.f32 %v2163_v30, 0.0  ;;  %v2113_v1 = vpop.f32.mrf.mxu1 }
 0x386   : > { %v3105_v50 = vpop.f32.mrf.mxu0 }
 0x387   : > { %v2198_v31 = vmax.f32 %v2166_v48, 0.0  ;;  %v2164_v52 = vadd.f32 %v4079_v36, %v2069_v49  ;;  %v2090_v53 = vadd.f32 %v4081_v38, %v3105_v50 }
 0x388   : > { %v1776_v55 = vpop.f32.mrf.mxu0 }
 0x389   : > { %v2742_v57 = vpack.c.bf16 %v2198_v31, %v2197_v51  ;;  %v2196_v58 = vmax.f32 %v2164_v52, 0.0  ;;  %v2082_v59 = vadd.f32 %v4084_v44, %v1776_v55  ;;  %v2169_v33 = vadd.f32 %v4079_v36, %v2090_v53 }
 0x38a   : > { %v3106_v60 = vpop.f32.mrf.mxu0 }
 0x38b   : > { %2790 = vst [vmem:[%s3954_s29 + $0x38] sm:$0xff] %v2742_v57   ;;  %v2737_v61 = vpack.c.bf16 %v2196_v58, %v2195_v56  ;;  %v2093_v62 = vadd.f32 %v4089_v54, %v3106_v60  ;;  %v2167_v38 = vadd.f32 %v4079_v36, %v2082_v59  ;;  %v2201_v5 = vmax.f32 %v2169_v33, 0.0  ;;  %v3162_v54 = vpop.f32.mrf.mxu1 }
 0x38c   : > { %v1779_v63 = vpop.f32.mrf.mxu0 }
 0x38d   : > { %2789 = vst [vmem:[%s3954_s29 + $0x30] sm:$0xff] %v2737_v61   ;;  %v2170_v2 = vadd.f32 %v4079_v36, %v2093_v62  ;;  %v2085_v3 = vadd.f32 %v4093_v0, %v1779_v63  ;;  %v2199_v9 = vmax.f32 %v2167_v38, 0.0  ;;  %v2116_v18 = vpop.f32.mrf.mxu1 }
 0x38e   : > { %v3109_v4 = vpop.f32.mrf.mxu0 }
 0x38f   : > { %v2202_v44 = vmax.f32 %v2170_v2, 0.0  ;;  %v2168_v6 = vadd.f32 %v4079_v36, %v2085_v3  ;;  %v2106_v7 = vadd.f32 %v4099_v10, %v3109_v4  ;;  %v3165_v27 = vpop.f32.mrf.mxu1 }
 0x390   : > { %v1792_v8 = vpop.f32.mrf.mxu0 }
 0x391   : > { %v2752_v11 = vpack.c.bf16 %v2202_v44, %v2201_v5  ;;  %v2200_v12 = vmax.f32 %v2168_v6, 0.0  ;;  %v2098_v13 = vadd.f32 %v2097_v20, %v1792_v8  ;;  %v2173_v16 = vadd.f32 %v4079_v36, %v2106_v7  ;;  %v2129_v43 = vpop.f32.mrf.mxu1 }
 0x392   : > { %v3110_v14 = vpop.f32.mrf.mxu0 }
 0x393   : > { %2792 = vst [vmem:[%s3954_s29 + $0x48] sm:$0xff] %v2752_v11   ;;  %v2747_v15 = vpack.c.bf16 %v2200_v12, %v2199_v9  ;;  %v2109_v0 = vadd.f32 %v3158_v37, %v3110_v14  ;;  %v2171_v19 = vadd.f32 %v4079_v36, %v2098_v13  ;;  %v2205_v23 = vmax.f32 %v2173_v16, 0.0  ;;  %v3166_v31 = vpop.f32.mrf.mxu1 }
 0x394   : > { %v1795_v17 = vpop.f32.mrf.mxu0 }
 0x395   : > { %2791 = vst [vmem:[%s3954_s29 + $0x40] sm:$0xff] %v2747_v15   ;;  %v2174_v10 = vadd.f32 %v4079_v36, %v2109_v0  ;;  %v2101_v21 = vadd.f32 %v2100_v47, %v1795_v17  ;;  %v2203_v34 = vmax.f32 %v2171_v19, 0.0  ;;  %v2132_v61 = vpop.f32.mrf.mxu1 }
 0x396   : > { %v3113_v22 = vpop.f32.mrf.mxu0 }
 0x397   : > { %v2206_v24 = vmax.f32 %v2174_v10, 0.0  ;;  %v2172_v20 = vadd.f32 %v4079_v36, %v2101_v21  ;;  %v2122_v25 = vadd.f32 %v3161_v32, %v3113_v22 }
 0x398   : > { %v1808_v26 = vpop.f32.mrf.mxu0 }
 0x399   : > { %v2762_v35 = vpack.c.bf16 %v2206_v24, %v2205_v23  ;;  %v2204_v37 = vmax.f32 %v2172_v20, 0.0  ;;  %v2114_v28 = vadd.f32 %v2113_v1, %v1808_v26  ;;  %v2177_v41 = vadd.f32 %v4079_v36, %v2122_v25 }
 0x39a   : > { %v3114_v39 = vpop.f32.mrf.mxu0 }
 0x39b   : > { %2794 = vst [vmem:[%s3954_s29 + $0x58] sm:$0xff] %v2762_v35   ;;  %v2757_v40 = vpack.c.bf16 %v2204_v37, %v2203_v34  ;;  %v2125_v42 = vadd.f32 %v3162_v54, %v3114_v39  ;;  %v2175_v45 = vadd.f32 %v4079_v36, %v2114_v28  ;;  %v2209_v48 = vmax.f32 %v2177_v41, 0.0 }
 0x39c   : > { %v1811_v29 = vpop.f32.mrf.mxu0 }
 0x39d   : > { %2793 = vst [vmem:[%s3954_s29 + $0x50] sm:$0xff] %v2757_v40   ;;  %v2178_v46 = vadd.f32 %v4079_v36, %v2125_v42  ;;  %v2117_v47 = vadd.f32 %v2116_v18, %v1811_v29  ;;  %v2207_v53 = vmax.f32 %v2175_v45, 0.0 }
 0x39e   : > { %v3117_v30 = vpop.f32.mrf.mxu0 }
 0x39f   : > { %v2210_v49 = vmax.f32 %v2178_v46, 0.0  ;;  %v2176_v50 = vadd.f32 %v4079_v36, %v2117_v47  ;;  %v2138_v51 = vadd.f32 %v3165_v27, %v3117_v30 }
 0x3a0   : > { %v1824_v52 = vpop.f32.mrf.mxu0 }
 0x3a1   : > { %v2772_v55 = vpack.c.bf16 %v2210_v49, %v2209_v48  ;;  %v2208_v32 = vmax.f32 %v2176_v50, 0.0  ;;  %v2130_v56 = vadd.f32 %v2129_v43, %v1824_v52  ;;  %v2181_v59 = vadd.f32 %v4079_v36, %v2138_v51 }
 0x3a2   : > { %v3118_v57 = vpop.f32.mrf.mxu0 }
 0x3a3   : > { %2796 = vst [vmem:[%s3954_s29 + $0x68] sm:$0xff] %v2772_v55   ;;  %v2767_v58 = vpack.c.bf16 %v2208_v32, %v2207_v53  ;;  %v2141_v60 = vadd.f32 %v3166_v31, %v3118_v57  ;;  %v2179_v62 = vadd.f32 %v4079_v36, %v2130_v56  ;;  %v2213_v38 = vmax.f32 %v2181_v59, 0.0 }
 0x3a4   : > { %v1827_v33 = vpop.f32.mrf.mxu0 }
 0x3a5   : > { %2795 = vst [vmem:[%s3954_s29 + $0x60] sm:$0xff] %v2767_v58   ;;  %v2182_v63 = vadd.f32 %v4079_v36, %v2141_v60  ;;  %v2133_v1 = vadd.f32 %v2132_v61, %v1827_v33  ;;  %v2211_v4 = vmax.f32 %v2179_v62, 0.0 }
 0x3a7   : > { %v2214_v2 = vmax.f32 %v2182_v63, 0.0  ;;  %v2180_v3 = vadd.f32 %v4079_v36, %v2133_v1 }
 0x3a9   : > { %v2782_v5 = vpack.c.bf16 %v2214_v2, %v2213_v38  ;;  %v2212_v44 = vmax.f32 %v2180_v3, 0.0 }
 0x3ab   : > { %2798 = vst [vmem:[%s3954_s29 + $0x78] sm:$0xff] %v2782_v5   ;;  %v2777_v6 = vpack.c.bf16 %v2212_v44, %v2211_v4 }
 0x3ad   : > { %2797 = vst [vmem:[%s3954_s29 + $0x70] sm:$0xff] %v2777_v6  }
 0x3ae   : > { %3502 = shalt.err (!%p3499_p0)
}
 0x3af   : > { %s3503_s1 = scalar_lea.hbm %s4151_s15, 2048  ;;  %s3507_s17 = scalar_lea.hbm %s4279_s16, 4096 }
 0x3b0   : > { %p3504_p2 = scmp.ne.s32.totalorder %s4151_s15, %s3503_s1  ;;  %p3508_p9 = scmp.lt.s32.totalorder %s4151_s15, %s4279_s16 }
 0x3b1   : > { %p3509_p13 = scmp.lt.s32.totalorder %s3507_s17, %s3503_s1 }
 0x3b2   : > { %p3505_p4 = pnand %p3504_p2, %p4280_p3 }
 0x3b3   : > { %p3510_p10 = por %p3509_p13, %p3508_p9 }
 0x3b4   : > { %p3506_p6 = pneg %p3505_p4 }
 0x3b6   : > { %p3511_p8 = pnand %p3510_p10, %p3506_p6 }
 0x3b8   : > { %3514 = shalt.err (!%p3511_p8)
}
 0x3b9   : > { %s3620_s20 = smov 64   ;;  %s3621_s29 = smov 4  }
 0x3ba   : > { %3181 = dma.vmem_to_hbm [thread:$0]  (%p4280_p3), %s4153_s11, 2048, %s4151_s15, %s4159_s12, %s3620_s20, %s3620_s20, %s3621_s29  }
 0x3bb PF: > { %s4281_s27 = sld [smem:[#allocation23_spill]]  ;;  %p4284_p12 = scmp.ge.s32.totalorder %s3607_s25, 2 }
 0x3bc   : > { %s4282_s10 = sld [smem:[#allocation25_spill]] }
 0x3c1   : > { %s2404_s9 = sand.u32 1, %s4281_s27  }
 0x3c2   : > { %p4283_p7 = scmp.ne.s32.totalorder %s4282_s10, 0  ;;  %s2405_s28 = scalar_lea.sflag [#allocation8], %s2404_s9 }
 0x3c4   : > { %p3200_p1 = pnand %p4284_p12, %p4283_p7 }
 0x3c6   : > { %p3201_p5 = pneg %p3200_p1 }
 0x3c8   : > { %3570 = dma.done.wait (%p3201_p5), %s2405_s28, 2048  }
 0x3c9   : > { %3572 = vsyncadd (%p3201_p5), %s2405_s28, 4294965248  ;;  %s39_s25 = sadd.s32 1, %s3607_s25   ;;  %s4285_s6 = sld [smem:[#allocation24_spill]] }
 0x3ca   : > { %p36_p11 = scmp.ge.s32.totalorder %s39_s25, 4   ;;  %s4286_s22 = sld [smem:[#allocation27_spill]] }
 0x3cb   : > { %s4287_s11 = sld [smem:[#allocation26_spill]]  ;;  %s4288_s1 = smov %s3579_s18 }
 0x3cc   : > { %s4289_s18 = smov %s3583_s19  ;;  %s4290_s19 = smov %s3830_s2 }
 0x3cd   : > { %s4291_s20 = smov %s3591_s21  ;;  %s4293_s23 = smov %s3603_s24 }
 0x3ce   :  { %38 = sbr.rel (!%p36_p11) target bundleno = 39 (0x27), region = 132 }
 0x3cf   : > { %s4292_s21 = smov %s4285_s6 }
 0x3d1   : > { %s4294_s24 = smov %s4287_s11 }
 0x3d3   :  { %2410 = vsyncpa [#allocation7], 1 }
 0x3d4   :  { %2412 = vsyncpa [#allocation7 + $0x1], 1 }
 0x3d5   :  { %2413 = vsyncpa [#allocation10], 1 }
 0x3d6   :  { %2415 = vsyncpa [#allocation10 + $0x1], 1 }
 0x3d7   :  { %2416 = vsyncpa [#allocation13], 1 }
 0x3d8   :  { %2417 = vsyncpa [#allocation8], 1 }
 0x3d9   :  { %2419 = vsyncpa [#allocation8 + $0x1], 1 }

</bundles_post_ra>
